<compile_context>
chip_gen: v7x
topology: tpu7x:2x2x1
jax: 0.10.0
libtpu: 0.0.40
codegen_flags: <defaults>
</compile_context>

<pallas_src>
import functools

import jax
import jax.numpy as jnp
from jax.experimental import pallas as pl
from jax.experimental.pallas import tpu as pltpu


# -----------------------------------------------------------------------------
# Pallas kernel: full RGA forward for one lane-packed slab of batch elements.
# x / out slab layout: (1, C, L) with L = b_blk*HW; element b occupies lanes
# [b*HW, (b+1)*HW) (channel-major, pixel index = h*W + w).
# -----------------------------------------------------------------------------
def rga_kernel(x_ref,
               wps_ref, wggs_ref, wws1j_ref, wpc_ref, wggc_ref, wwc1j_ref,
               colp_ref, rowp_ref,
               out_ref, *, IC, IS, KS, KC, C, HW, b_blk):
    f32 = jnp.float32
    cdt = wps_ref.dtype                       # matmul-input dtype (bf16 or f32)

    def mm(a, b):                             # a @ b        (f32 accumulation)
        return jax.lax.dot_general(a.astype(cdt), b.astype(cdt),
                                   (((1,), (0,)), ((), ())),
                                   preferred_element_type=f32)

    def mm_ta(a, b):                          # a^T @ b      (contract dim 0 of both)
        return jax.lax.dot_general(a.astype(cdt), b.astype(cdt),
                                   (((0,), (0,)), ((), ())),
                                   preferred_element_type=f32)

    def mm_tb(a, b):                          # a @ b^T      (contract dim 1 of both)
        return jax.lax.dot_general(a.astype(cdt), b.astype(cdt),
                                   (((1,), (1,)), ((), ())),
                                   preferred_element_type=f32)

    relu = lambda v: jnp.maximum(v, 0.0)
    # sigmoid(v) = 0.5*tanh(v/2)+0.5 : tanh runs on the EUP slot, no VPU divide.
    sigm = lambda v: 0.5 * jnp.tanh(0.5 * v) + 0.5

    # ---- weights / packed biases: loaded once per grid step -----------------
    wps = wps_ref[...]                         # (2IC+IS, C)  fused [theta|phi|gx]^T
    wggs = wggs_ref[...]                       # (2HW, IS)
    wggs_in, wggs_out = wggs[:HW], wggs[HW:]
    wws1j = wws1j_ref[...]                     # (KS, IS)
    wpc = wpc_ref[...]                         # (3IS, HW)    fused [thc|phc|gxc]^T
    wggc = wggc_ref[...]                       # (2C, IC)
    wggc_in, wggc_out = wggc[:C], wggc[C:]
    wwc1j = wwc1j_ref[...]                     # (IC, KC)

    col = colp_ref[...]                        # (NCOL, 1) packed column params (f32)
    o = 0
    bps = col[o:o + 2 * IC + IS]; o += 2 * IC + IS
    bggs = col[o:o + IS]; o += IS
    wws1g = col[o:o + KS]; o += KS
    bws1 = col[o:o + KS]; o += KS
    wws2 = col[o:o + KS]; o += KS
    bws2 = col[o:o + 1]; o += 1
    bpc = col[o:o + 3 * IS]

    row = rowp_ref[...]                        # (1, NROW) packed row params (f32)
    r = 0
    bggc = row[:, r:r + IC]; r += IC
    wwc1g = row[:, r:r + KC]; r += KC
    bwc1 = row[:, r:r + KC]; r += KC
    wwc2 = row[:, r:r + KC]; r += KC
    bwc2 = row[:, r:r + 1]

    # mean over IS expressed as an f32 matvec -> directly a (C,1) column;
    # kept in f32 so the channel mean is exact even in the bf16 path.
    inv_is = jnp.full((IS, 1), 1.0 / IS, f32)

    xs = x_ref[0]                              # (C, L) slab, L = b_blk*HW

    # ---------------- spatial relation branch --------------------------------
    # One lane-dense projection for the whole slab (all b_blk elements at once).
    ps = relu(mm(wps, xs) + bps)               # (2IC+IS, L)

    s_gates = []
    for b in range(b_blk):                     # tiny per-element Gram/gate math
        sl = slice(b * HW, (b + 1) * HW)
        theta_t = ps[:IC, sl]                  # (IC, HW)  = theta^T
        phi_t = ps[IC:2 * IC, sl]              # (IC, HW)  = phi^T
        gxs_t = ps[2 * IC:, sl]                # (IS, HW)
        # Gram elimination: (theta @ phi^T) @ W == theta @ (phi^T @ W)
        a_s = mm(phi_t, wggs_in)               # (IC, IS)
        b_s = mm(theta_t, wggs_out)            # (IC, IS)
        gs_joint = relu(mm_ta(a_s, theta_t) + mm_ta(b_s, phi_t) + bggs)   # (IS, HW)
        g_xs = jnp.mean(gxs_t, axis=0, keepdims=True)                     # (1, HW)
        w1 = relu(wws1g * g_xs + mm(wws1j, gs_joint) + bws1)              # (KS, HW)
        w_ys = jnp.sum(w1 * wws2, axis=0, keepdims=True) + bws2           # (1, HW)
        s_gates.append(sigm(w_ys))
    s_gate = s_gates[0] if b_blk == 1 else jnp.concatenate(s_gates, axis=1)  # (1, L)

    xsp = s_gate * xs.astype(f32)              # (C, L) spatially gated slab

    # ---------------- channel relation branch --------------------------------
    c_gates = []
    for b in range(b_blk):
        xsp_b = xsp[:, b * HW:(b + 1) * HW]    # (C, HW)
        pc_t = relu(mm_tb(wpc, xsp_b) + bpc)   # (3IS, C)
        thc_t = pc_t[:IS]                      # (IS, C) = theta_c^T
        phc_t = pc_t[IS:2 * IS]                # (IS, C) = phi_c^T
        gxc_t = pc_t[2 * IS:]                  # (IS, C)
        a_c = mm(phc_t, wggc_in)               # (IS, IC)
        b_c = mm(thc_t, wggc_out)              # (IS, IC)
        gc_joint = relu(mm_ta(thc_t, a_c) + mm_ta(phc_t, b_c) + bggc)     # (C, IC)
        g_xc = jax.lax.dot_general(gxc_t, inv_is, (((0,), (0,)), ((), ())),
                                   preferred_element_type=f32)            # (C, 1)
        w1c = relu(g_xc * wwc1g + mm(gc_joint, wwc1j) + bwc1)             # (C, KC)
        w_yc = jnp.sum(w1c * wwc2, axis=1, keepdims=True) + bwc2          # (C, 1)
        c_gates.append(jnp.broadcast_to(sigm(w_yc), (C, HW)))
    c_gate = c_gates[0] if b_blk == 1 else jnp.concatenate(c_gates, axis=1)  # (C, L)

    out_ref[0] = (c_gate * xsp).astype(out_ref.dtype)       # lane-dense store


# -----------------------------------------------------------------------------
# One-time parameter fusion (do this at model init, NOT per forward call).
# -----------------------------------------------------------------------------
def prepare_rga_params(P, dot_dtype=jnp.bfloat16):
    f32 = jnp.float32
    dd = dot_dtype
    C, IC = P["wt"].shape
    IS = P["wgxs"].shape[1]
    KS = P["wws1"].shape[1]
    KC = P["wwc1"].shape[1]
    HW = P["wggs"].shape[0] // 2

    # Matmul weights (stored in the matmul-input dtype).
    wps = jnp.concatenate([P["wt"], P["wp"], P["wgxs"]], axis=1).T.astype(dd)    # (2IC+IS, C)
    wggs = P["wggs"].astype(dd)                                                  # (2HW, IS)
    wws1j = P["wws1"][1:, :].T.astype(dd)                                        # (KS, IS)
    wpc = jnp.concatenate([P["wtc"], P["wpc"], P["wgxc"]], axis=1).T.astype(dd)  # (3IS, HW)
    wggc = P["wggc"].astype(dd)                                                  # (2C, IC)
    wwc1j = P["wwc1"][1:, :].astype(dd)                                          # (IC, KC)

    # Packed f32 column params: [bps; bggs; wws1g; bws1; wws2; bws2; bpc].
    col_pack = jnp.concatenate(
        [jnp.concatenate([P["bt"], P["bp"], P["bgxs"]], axis=1).T,   # (2IC+IS, 1)
         P["bggs"].T,                                                # (IS, 1)
         P["wws1"][0:1, :].T,                                        # (KS, 1)
         P["bws1"].T,                                                # (KS, 1)
         P["wws2"],                                                  # (KS, 1)
         P["bws2"],                                                  # (1, 1)
         jnp.concatenate([P["btc"], P["bpc"], P["bgxc"]], axis=1).T  # (3IS, 1)
         ], axis=0).astype(f32)

    # Packed f32 row params: [bggc | wwc1g | bwc1 | wwc2 | bwc2].
    row_pack = jnp.concatenate(
        [P["bggc"], P["wwc1"][0:1, :], P["bwc1"], P["wwc2"].T, P["bwc2"]],
        axis=1).astype(f32)

    arrays = (wps, wggs, wws1j, wpc, wggc, wwc1j, col_pack, row_pack)
    dims = dict(IC=IC, IS=IS, KS=KS, KC=KC, C=C, HW=HW)
    return arrays, dims


# -----------------------------------------------------------------------------
# Generation-aware grid sizing.
# -----------------------------------------------------------------------------
def _num_tensorcores_per_chip():
    """2 on v7x-class chips (two TensorCores per chip), else 1 (v5e/v6e)."""
    try:
        info = pltpu.get_tpu_info()
        for attr in ("num_tensorcores", "tensorcores_per_chip", "num_tensor_cores"):
            n = getattr(info, attr, None)
            if n is not None:
                n = int(n)
                if n >= 1:
                    return n
        ver = getattr(info, "chip_version", None)
        if ver is not None and "7" in str(ver):
            return 2
    except Exception:
        pass
    return 1


def _pick_num_blocks(B, HW, num_tc):
    # Target lane-dense slabs (>=256 lanes when the batch allows) while capping
    # the in-kernel per-element unroll at 4 (guards the 64-entry vreg file).
    max_per_block = max(1, min(4, pl.cdiv(256, HW)))
    nb = num_tc if (num_tc > 1 and B % num_tc == 0) else 1
    while B % (nb * 2) == 0 and B // nb > max_per_block:
        nb *= 2
    return nb


# -----------------------------------------------------------------------------
# Wrapper: lane packing + pallas_call glue (parameter fusion already done).
# -----------------------------------------------------------------------------
def rga_pallas(x_nchw, prepared, *, num_blocks=None):
    arrays, dims = prepared
    IC, IS, KS, KC = dims["IC"], dims["IS"], dims["KS"], dims["KC"]
    B, C, H, W = x_nchw.shape
    HW = H * W
    assert C == dims["C"] and HW == dims["HW"]

    if num_blocks is None:
        num_blocks = _pick_num_blocks(B, HW, _num_tensorcores_per_chip())
    assert B % num_blocks == 0
    b_blk = B // num_blocks
    L = b_blk * HW
    dd = arrays[0].dtype

    # Host-side lane packing (tiny XLA transpose): (B,C,H,W) -> (nb, C, b_blk*HW).
    x_slab = (x_nchw.reshape(num_blocks, b_blk, C, HW)
              .transpose(0, 2, 1, 3)
              .reshape(num_blocks, C, L)
              .astype(dd))

    kernel = functools.partial(rga_kernel, **dims, b_blk=b_blk)

    x_spec = pl.BlockSpec((1, C, L), lambda i: (i, 0, 0))
    out_spec = pl.BlockSpec((1, C, L), lambda i: (i, 0, 0))
    param_specs = [pl.BlockSpec(a.shape, lambda i, _nd=a.ndim: (0,) * _nd)
                   for a in arrays]

    # Advisory cost estimate so XLA schedules around this small custom call.
    flops_per_elem = 2 * ((2 * IC + IS) * C * HW          # spatial projection
                          + 2 * IC * HW * IS              # a_s, b_s
                          + 2 * IS * IC * HW               # gs_joint
                          + KS * IS * HW                   # w1
                          + 3 * IS * HW * C                # channel projection
                          + 2 * IS * C * IC                # a_c, b_c
                          + 2 * C * IS * IC                # gc_joint
                          + C * IC * KC)                   # w1c
    weight_bytes = sum(int(a.size) * jnp.dtype(a.dtype).itemsize for a in arrays)
    cost = pl.CostEstimate(
        flops=int(B * flops_per_elem),
        transcendentals=int(B * (HW + C)),
        bytes_accessed=int(B * C * HW * (jnp.dtype(dd).itemsize + 4) + weight_bytes))

    # VMEM budget: only raise above the 32 MiB scoped default when needed
    # (v7x has 64 MiB physical per TensorCore).
    block_bytes = C * L * (jnp.dtype(dd).itemsize + 4)     # in (dd) + out (f32)
    vmem_need = 4 * block_bytes + 2 * weight_bytes + (8 << 20)
    vmem_limit = min(vmem_need, 100 << 20) if vmem_need > (32 << 20) else None

    out_slab = pl.pallas_call(
        kernel,
        out_shape=jax.ShapeDtypeStruct((num_blocks, C, L), jnp.float32),
        grid=(num_blocks,),
        in_specs=[x_spec] + param_specs,
        out_specs=out_spec,
        compiler_params=pltpu.CompilerParams(
            dimension_semantics=("parallel",),
            vmem_limit_bytes=vmem_limit),
        cost_estimate=cost,
    )(x_slab, *arrays)

    # Undo the lane packing.
    return (out_slab.reshape(num_blocks, C, b_blk, HW)
            .transpose(0, 2, 1, 3)
            .reshape(B, C, H, W))


# -----------------------------------------------------------------------------
# Deterministic parameter construction: Conv2d(1x1, bias=False) + BatchNorm2d
# folded into  y = x @ Wm + bias   (Wm: (in, out), bias: (1, out)).
# -----------------------------------------------------------------------------
def make_conv_bn(key, cin, cout, eps=1e-5):
    kW, kg, kb, km, kv = jax.random.split(key, 5)
    W = 0.1 * jax.random.normal(kW, (cout, cin), jnp.float32)
    gamma = 1.0 + 0.1 * jax.random.normal(kg, (cout,), jnp.float32)
    beta = 0.1 * jax.random.normal(kb, (cout,), jnp.float32)
    mean = 0.1 * jax.random.normal(km, (cout,), jnp.float32)
    var = 0.5 + 0.5 * jnp.abs(jax.random.normal(kv, (cout,), jnp.float32))
    scale = gamma / jnp.sqrt(var + eps)
    Wm = (W * scale[:, None]).T                      # (cin, cout)
    bias = (beta - mean * scale).reshape(1, cout)    # (1, cout)
    return Wm, bias


def build_params(key, C, HW, cha_ratio=8, spa_ratio=8, down_ratio=7):
    IC = C // cha_ratio
    IS = HW // spa_ratio
    KS = (1 + IS) // down_ratio
    KC = (1 + IC) // down_ratio
    assert KS >= 1 and KC >= 1, "choose shapes so the W_* bottlenecks are non-empty"
    ks = jax.random.split(key, 12)
    P = {}
    P["wt"], P["bt"] = make_conv_bn(ks[0], C, IC)            # theta_spatial
    P["wp"], P["bp"] = make_conv_bn(ks[1], C, IC)            # phi_spatial
    P["wggs"], P["bggs"] = make_conv_bn(ks[2], 2 * HW, IS)   # gg_spatial
    P["wgxs"], P["bgxs"] = make_conv_bn(ks[3], C, IS)        # gx_spatial
    P["wws1"], P["bws1"] = make_conv_bn(ks[4], 1 + IS, KS)   # W_spatial conv1
    P["wws2"], P["bws2"] = make_conv_bn(ks[5], KS, 1)        # W_spatial conv2
    P["wtc"], P["btc"] = make_conv_bn(ks[6], HW, IS)         # theta_channel
    P["wpc"], P["bpc"] = make_conv_bn(ks[7], HW, IS)         # phi_channel
    P["wggc"], P["bggc"] = make_conv_bn(ks[8], 2 * C, IC)    # gg_channel
    P["wgxc"], P["bgxc"] = make_conv_bn(ks[9], HW, IS)       # gx_channel
    P["wwc1"], P["bwc1"] = make_conv_bn(ks[10], 1 + IC, KC)  # W_channel conv1
    P["wwc2"], P["bwc2"] = make_conv_bn(ks[11], KC, 1)       # W_channel conv2
    return P, IC, IS


# -----------------------------------------------------------------------------
# Pure-JAX reference mirroring the PyTorch forward in NCHW (for verification).
# -----------------------------------------------------------------------------
def ref_forward(x, P):
    HI = jax.lax.Precision.HIGHEST
    B, C, H, W = x.shape
    HW = H * W
    sigm = lambda v: 1.0 / (1.0 + jnp.exp(-v))

    def cbr(z, Wm, bias, relu=True):
        y = jnp.einsum("bihw,io->bohw", z, Wm, precision=HI)
        y = y + bias.reshape(1, -1, 1, 1)
        return jnp.maximum(y, 0.0) if relu else y

    IC = P["wt"].shape[1]

    # spatial branch
    theta = cbr(x, P["wt"], P["bt"]).reshape(B, IC, HW).transpose(0, 2, 1)
    phi = cbr(x, P["wp"], P["bp"]).reshape(B, IC, HW)
    Gs = jnp.einsum("bpk,bkq->bpq", theta, phi, precision=HI)        # (B,HW,HW)
    Gs_in = Gs.transpose(0, 2, 1).reshape(B, HW, H, W)
    Gs_out = Gs.reshape(B, HW, H, W)
    Gs_joint = cbr(jnp.concatenate([Gs_in, Gs_out], axis=1), P["wggs"], P["bggs"])
    g_xs = jnp.mean(cbr(x, P["wgxs"], P["bgxs"]), axis=1, keepdims=True)
    ys = jnp.concatenate([g_xs, Gs_joint], axis=1)
    w1 = cbr(ys, P["wws1"], P["bws1"])
    w_ys = cbr(w1, P["wws2"], P["bws2"], relu=False)                 # (B,1,H,W)
    x = sigm(w_ys) * x

    # channel branch
    xc = x.reshape(B, C, HW).transpose(0, 2, 1)[..., None]           # (B,HW,C,1)
    theta_c = cbr(xc, P["wtc"], P["btc"])[..., 0].transpose(0, 2, 1) # (B,C,IS)
    phi_c = cbr(xc, P["wpc"], P["bpc"])[..., 0]                      # (B,IS,C)
    Gc = jnp.einsum("bmk,bkn->bmn", theta_c, phi_c, precision=HI)    # (B,C,C)
    Gc_in = Gc.transpose(0, 2, 1)[..., None]
    Gc_out = Gc[..., None]
    Gc_joint = cbr(jnp.concatenate([Gc_in, Gc_out], axis=1), P["wggc"], P["bggc"])
    g_xc = jnp.mean(cbr(xc, P["wgxc"], P["bgxc"]), axis=1, keepdims=True)
    yc = jnp.concatenate([g_xc, Gc_joint], axis=1)
    w1c = cbr(yc, P["wwc1"], P["bwc1"])
    w_yc = cbr(w1c, P["wwc2"], P["bwc2"], relu=False)                # (B,1,C,1)
    w_yc = w_yc.transpose(0, 2, 1, 3)                                # (B,C,1,1)
    return sigm(w_yc) * x


# -----------------------------------------------------------------------------
if __name__ == "__main__":
    # in_channels=64, in_spatial=8*8=64, cha_ratio=spa_ratio=8, down_ration=7
    B, C, H, W = 2, 64, 8, 8
    HW = H * W

    master = jax.random.PRNGKey(0)
    kparam, kx = jax.random.split(master)
    P, IC, IS = build_params(kparam, C, HW)
    x = jax.random.normal(kx, (B, C, H, W), jnp.float32)

    ref = ref_forward(x, P)

    # f32 matmul-input path: tight check against the f32 reference.
    prep_f32 = prepare_rga_params(P, dot_dtype=jnp.float32)
    out_f32 = jax.block_until_ready(rga_pallas(x, prep_f32))
    err_f32 = float(jnp.max(jnp.abs(out_f32 - ref)))
    if not err_f32 < 2e-3:
        raise AssertionError(f"f32 path mismatch, max abs err = {err_f32}")

    # bf16 matmul-input path (the default): loose sanity tolerance vs f32 ref.
    prep_bf16 = prepare_rga_params(P)          # dot_dtype defaults to bfloat16
    out_bf16 = jax.block_until_ready(rga_pallas(x, prep_bf16))
    err_bf16 = float(jnp.max(jnp.abs(out_bf16 - ref)))
    if not err_bf16 < 1.5e-1:
        raise AssertionError(f"bf16 path mismatch, max abs err = {err_bf16}")

    print("KERNEL_OK")
</pallas_src>

<mosaic_0001>
module attributes {stable_mosaic.version = 11 : i64} {
  func.func @rga_kernel(%arg0: i32, %arg1: memref<1x64x128xf32, #tpu.memory_space<vmem>>, %arg2: memref<24x64xf32, #tpu.memory_space<vmem>>, %arg3: memref<128x8xf32, #tpu.memory_space<vmem>>, %arg4: memref<1x8xf32, #tpu.memory_space<vmem>>, %arg5: memref<24x64xf32, #tpu.memory_space<vmem>>, %arg6: memref<128x8xf32, #tpu.memory_space<vmem>>, %arg7: memref<8x1xf32, #tpu.memory_space<vmem>>, %arg8: memref<60x1xf32, #tpu.memory_space<vmem>>, %arg9: memref<1x12xf32, #tpu.memory_space<vmem>>, %arg10: memref<1x64x128xf32, #tpu.memory_space<vmem>>) attributes {dimension_semantics = [#tpu.dimension_semantics<parallel>], iteration_bounds = array<i64: 1>, scalar_prefetch = 0 : i64, scratch_operands = 0 : i64, tpu.core_type = #tpu.core_type<tc>, window_params = [{transform_indices = @transform_0, window_bounds = array<i64: 1, 64, 128>}, {pipeline_mode = #tpu.pipeline_mode<synchronous>, transform_indices = @transform_1, window_bounds = array<i64: 24, 64>}, {pipeline_mode = #tpu.pipeline_mode<synchronous>, transform_indices = @transform_2, window_bounds = array<i64: 128, 8>}, {pipeline_mode = #tpu.pipeline_mode<synchronous>, transform_indices = @transform_3, window_bounds = array<i64: 1, 8>}, {pipeline_mode = #tpu.pipeline_mode<synchronous>, transform_indices = @transform_4, window_bounds = array<i64: 24, 64>}, {pipeline_mode = #tpu.pipeline_mode<synchronous>, transform_indices = @transform_5, window_bounds = array<i64: 128, 8>}, {pipeline_mode = #tpu.pipeline_mode<synchronous>, transform_indices = @transform_6, window_bounds = array<i64: 8, 1>}, {pipeline_mode = #tpu.pipeline_mode<synchronous>, transform_indices = @transform_7, window_bounds = array<i64: 60, 1>}, {pipeline_mode = #tpu.pipeline_mode<synchronous>, transform_indices = @transform_8, window_bounds = array<i64: 1, 12>}, {transform_indices = @transform_9, window_bounds = array<i64: 1, 64, 128>}]} {
    %c0 = arith.constant 0 : index
    %c0_0 = arith.constant 0 : index
    %0 = vector.load %arg2[%c0, %c0_0] : memref<24x64xf32, #tpu.memory_space<vmem>>, vector<24x64xf32>
    %c0_1 = arith.constant 0 : index
    %c0_2 = arith.constant 0 : index
    %1 = vector.load %arg3[%c0_1, %c0_2] : memref<128x8xf32, #tpu.memory_space<vmem>>, vector<128x8xf32>
    %2 = vector.extract_strided_slice %1 {offsets = [0, 0], sizes = [64, 8], strides = [1, 1]} : vector<128x8xf32> to vector<64x8xf32>
    %3 = vector.extract_strided_slice %1 {offsets = [64, 0], sizes = [64, 8], strides = [1, 1]} : vector<128x8xf32> to vector<64x8xf32>
    %c0_3 = arith.constant 0 : index
    %c0_4 = arith.constant 0 : index
    %4 = vector.load %arg4[%c0_3, %c0_4] : memref<1x8xf32, #tpu.memory_space<vmem>>, vector<1x8xf32>
    %c0_5 = arith.constant 0 : index
    %c0_6 = arith.constant 0 : index
    %5 = vector.load %arg5[%c0_5, %c0_6] : memref<24x64xf32, #tpu.memory_space<vmem>>, vector<24x64xf32>
    %c0_7 = arith.constant 0 : index
    %c0_8 = arith.constant 0 : index
    %6 = vector.load %arg6[%c0_7, %c0_8] : memref<128x8xf32, #tpu.memory_space<vmem>>, vector<128x8xf32>
    %7 = vector.extract_strided_slice %6 {offsets = [0, 0], sizes = [64, 8], strides = [1, 1]} : vector<128x8xf32> to vector<64x8xf32>
    %8 = vector.extract_strided_slice %6 {offsets = [64, 0], sizes = [64, 8], strides = [1, 1]} : vector<128x8xf32> to vector<64x8xf32>
    %c0_9 = arith.constant 0 : index
    %c0_10 = arith.constant 0 : index
    %9 = vector.load %arg7[%c0_9, %c0_10] : memref<8x1xf32, #tpu.memory_space<vmem>>, vector<8x1xf32>
    %c0_11 = arith.constant 0 : index
    %c0_12 = arith.constant 0 : index
    %10 = vector.load %arg8[%c0_11, %c0_12] : memref<60x1xf32, #tpu.memory_space<vmem>>, vector<60x1xf32>
    %11 = vector.extract_strided_slice %10 {offsets = [0, 0], sizes = [24, 1], strides = [1, 1]} : vector<60x1xf32> to vector<24x1xf32>
    %12 = vector.extract_strided_slice %10 {offsets = [24, 0], sizes = [8, 1], strides = [1, 1]} : vector<60x1xf32> to vector<8x1xf32>
    %13 = vector.extract_strided_slice %10 {offsets = [32, 0], sizes = [1, 1], strides = [1, 1]} : vector<60x1xf32> to vector<1x1xf32>
    %14 = vector.extract_strided_slice %10 {offsets = [33, 0], sizes = [1, 1], strides = [1, 1]} : vector<60x1xf32> to vector<1x1xf32>
    %15 = vector.extract_strided_slice %10 {offsets = [34, 0], sizes = [1, 1], strides = [1, 1]} : vector<60x1xf32> to vector<1x1xf32>
    %16 = vector.extract_strided_slice %10 {offsets = [35, 0], sizes = [1, 1], strides = [1, 1]} : vector<60x1xf32> to vector<1x1xf32>
    %17 = vector.extract_strided_slice %10 {offsets = [36, 0], sizes = [24, 1], strides = [1, 1]} : vector<60x1xf32> to vector<24x1xf32>
    %c0_13 = arith.constant 0 : index
    %c0_14 = arith.constant 0 : index
    %18 = vector.load %arg9[%c0_13, %c0_14] : memref<1x12xf32, #tpu.memory_space<vmem>>, vector<1x12xf32>
    %19 = vector.extract_strided_slice %18 {offsets = [0, 0], sizes = [1, 8], strides = [1, 1]} : vector<1x12xf32> to vector<1x8xf32>
    %20 = vector.extract_strided_slice %18 {offsets = [0, 8], sizes = [1, 1], strides = [1, 1]} : vector<1x12xf32> to vector<1x1xf32>
    %21 = vector.extract_strided_slice %18 {offsets = [0, 9], sizes = [1, 1], strides = [1, 1]} : vector<1x12xf32> to vector<1x1xf32>
    %22 = vector.extract_strided_slice %18 {offsets = [0, 10], sizes = [1, 1], strides = [1, 1]} : vector<1x12xf32> to vector<1x1xf32>
    %23 = vector.extract_strided_slice %18 {offsets = [0, 11], sizes = [1, 1], strides = [1, 1]} : vector<1x12xf32> to vector<1x1xf32>
    %cst = arith.constant 1.250000e-01 : f32
    %24 = vector.broadcast %cst : f32 to vector<8x1xf32>
    %c0_15 = arith.constant 0 : index
    %c0_16 = arith.constant 0 : index
    %c0_17 = arith.constant 0 : index
    %25 = vector.load %arg1[%c0_15, %c0_16, %c0_17] : memref<1x64x128xf32, #tpu.memory_space<vmem>>, vector<1x64x128xf32>
    %26 = vector.shape_cast %25 : vector<1x64x128xf32> to vector<64x128xf32>
    %cst_18 = arith.constant dense<0.000000e+00> : vector<24x128xf32>
    %27 = tpu.matmul %0, %26, %cst_18 {dimension_numbers = #tpu.dot_dimension_numbers<[1], [0], [0], [1], [0, 0, 1, 1], [], []>} : vector<24x64xf32>, vector<64x128xf32>, vector<24x128xf32> -> vector<24x128xf32>
    %28 = vector.broadcast %11 : vector<24x1xf32> to vector<24x128xf32>
    %29 = arith.addf %27, %28 : vector<24x128xf32>
    %cst_19 = arith.constant 0.000000e+00 : f32
    %30 = vector.broadcast %cst_19 : f32 to vector<24x128xf32>
    %31 = arith.maximumf %29, %30 : vector<24x128xf32>
    %32 = vector.extract_strided_slice %31 {offsets = [0, 0], sizes = [8, 64], strides = [1, 1]} : vector<24x128xf32> to vector<8x64xf32>
    %33 = vector.extract_strided_slice %31 {offsets = [8, 0], sizes = [8, 64], strides = [1, 1]} : vector<24x128xf32> to vector<8x64xf32>
    %34 = vector.extract_strided_slice %31 {offsets = [16, 0], sizes = [8, 64], strides = [1, 1]} : vector<24x128xf32> to vector<8x64xf32>
    %cst_20 = arith.constant dense<0.000000e+00> : vector<8x8xf32>
    %35 = tpu.matmul %33, %2, %cst_20 {dimension_numbers = #tpu.dot_dimension_numbers<[1], [0], [0], [1], [0, 0, 1, 1], [], []>} : vector<8x64xf32>, vector<64x8xf32>, vector<8x8xf32> -> vector<8x8xf32>
    %cst_21 = arith.constant dense<0.000000e+00> : vector<8x8xf32>
    %36 = tpu.matmul %32, %3, %cst_21 {dimension_numbers = #tpu.dot_dimension_numbers<[1], [0], [0], [1], [0, 0, 1, 1], [], []>} : vector<8x64xf32>, vector<64x8xf32>, vector<8x8xf32> -> vector<8x8xf32>
    %cst_22 = arith.constant dense<0.000000e+00> : vector<8x64xf32>
    %37 = tpu.matmul %35, %32, %cst_22 {dimension_numbers = #tpu.dot_dimension_numbers<[0], [0], [1], [1], [0, 1, 1, 1], [], []>} : vector<8x8xf32>, vector<8x64xf32>, vector<8x64xf32> -> vector<8x64xf32>
    %cst_23 = arith.constant dense<0.000000e+00> : vector<8x64xf32>
    %38 = tpu.matmul %36, %33, %cst_23 {dimension_numbers = #tpu.dot_dimension_numbers<[0], [0], [1], [1], [0, 1, 1, 1], [], []>} : vector<8x8xf32>, vector<8x64xf32>, vector<8x64xf32> -> vector<8x64xf32>
    %39 = arith.addf %37, %38 : vector<8x64xf32>
    %40 = vector.broadcast %12 : vector<8x1xf32> to vector<8x64xf32>
    %41 = arith.addf %39, %40 : vector<8x64xf32>
    %cst_24 = arith.constant 0.000000e+00 : f32
    %42 = vector.broadcast %cst_24 : f32 to vector<8x64xf32>
    %43 = arith.maximumf %41, %42 : vector<8x64xf32>
    %cst_25 = arith.constant dense<0.000000e+00> : vector<64xf32>
    %44 = vector.multi_reduction <add>, %34, %cst_25 [0] : vector<8x64xf32> to vector<64xf32>
    %45 = vector.shape_cast %44 : vector<64xf32> to vector<1x64xf32>
    %cst_26 = arith.constant 8.000000e+00 : f32
    %46 = vector.broadcast %cst_26 : f32 to vector<1x64xf32>
    %47 = arith.divf %45, %46 : vector<1x64xf32>
    %48 = vector.broadcast %13 : vector<1x1xf32> to vector<1x64xf32>
    %49 = arith.mulf %48, %47 : vector<1x64xf32>
    %cst_27 = arith.constant dense<0.000000e+00> : vector<1x64xf32>
    %50 = tpu.matmul %4, %43, %cst_27 {dimension_numbers = #tpu.dot_dimension_numbers<[1], [0], [0], [1], [0, 0, 1, 1], [], []>} : vector<1x8xf32>, vector<8x64xf32>, vector<1x64xf32> -> vector<1x64xf32>
    %51 = arith.addf %49, %50 : vector<1x64xf32>
    %52 = vector.broadcast %14 : vector<1x1xf32> to vector<1x64xf32>
    %53 = arith.addf %51, %52 : vector<1x64xf32>
    %cst_28 = arith.constant 0.000000e+00 : f32
    %54 = vector.broadcast %cst_28 : f32 to vector<1x64xf32>
    %55 = arith.maximumf %53, %54 : vector<1x64xf32>
    %56 = vector.broadcast %15 : vector<1x1xf32> to vector<1x64xf32>
    %57 = arith.mulf %55, %56 : vector<1x64xf32>
    %cst_29 = arith.constant dense<0.000000e+00> : vector<64xf32>
    %58 = vector.multi_reduction <add>, %57, %cst_29 [0] : vector<1x64xf32> to vector<64xf32>
    %59 = vector.shape_cast %58 : vector<64xf32> to vector<1x64xf32>
    %60 = vector.broadcast %16 : vector<1x1xf32> to vector<1x64xf32>
    %61 = arith.addf %59, %60 : vector<1x64xf32>
    %cst_30 = arith.constant 5.000000e-01 : f32
    %62 = vector.broadcast %cst_30 : f32 to vector<1x64xf32>
    %63 = arith.mulf %62, %61 : vector<1x64xf32>
    %64 = math.tanh %63 : vector<1x64xf32>
    %cst_31 = arith.constant 5.000000e-01 : f32
    %65 = vector.broadcast %cst_31 : f32 to vector<1x64xf32>
    %66 = arith.mulf %65, %64 : vector<1x64xf32>
    %cst_32 = arith.constant 5.000000e-01 : f32
    %67 = vector.broadcast %cst_32 : f32 to vector<1x64xf32>
    %68 = arith.addf %66, %67 : vector<1x64xf32>
    %69 = vector.extract_strided_slice %31 {offsets = [0, 64], sizes = [8, 64], strides = [1, 1]} : vector<24x128xf32> to vector<8x64xf32>
    %70 = vector.extract_strided_slice %31 {offsets = [8, 64], sizes = [8, 64], strides = [1, 1]} : vector<24x128xf32> to vector<8x64xf32>
    %71 = vector.extract_strided_slice %31 {offsets = [16, 64], sizes = [8, 64], strides = [1, 1]} : vector<24x128xf32> to vector<8x64xf32>
    %cst_33 = arith.constant dense<0.000000e+00> : vector<8x8xf32>
    %72 = tpu.matmul %70, %2, %cst_33 {dimension_numbers = #tpu.dot_dimension_numbers<[1], [0], [0], [1], [0, 0, 1, 1], [], []>} : vector<8x64xf32>, vector<64x8xf32>, vector<8x8xf32> -> vector<8x8xf32>
    %cst_34 = arith.constant dense<0.000000e+00> : vector<8x8xf32>
    %73 = tpu.matmul %69, %3, %cst_34 {dimension_numbers = #tpu.dot_dimension_numbers<[1], [0], [0], [1], [0, 0, 1, 1], [], []>} : vector<8x64xf32>, vector<64x8xf32>, vector<8x8xf32> -> vector<8x8xf32>
    %cst_35 = arith.constant dense<0.000000e+00> : vector<8x64xf32>
    %74 = tpu.matmul %72, %69, %cst_35 {dimension_numbers = #tpu.dot_dimension_numbers<[0], [0], [1], [1], [0, 1, 1, 1], [], []>} : vector<8x8xf32>, vector<8x64xf32>, vector<8x64xf32> -> vector<8x64xf32>
    %cst_36 = arith.constant dense<0.000000e+00> : vector<8x64xf32>
    %75 = tpu.matmul %73, %70, %cst_36 {dimension_numbers = #tpu.dot_dimension_numbers<[0], [0], [1], [1], [0, 1, 1, 1], [], []>} : vector<8x8xf32>, vector<8x64xf32>, vector<8x64xf32> -> vector<8x64xf32>
    %76 = arith.addf %74, %75 : vector<8x64xf32>
    %77 = vector.broadcast %12 : vector<8x1xf32> to vector<8x64xf32>
    %78 = arith.addf %76, %77 : vector<8x64xf32>
    %cst_37 = arith.constant 0.000000e+00 : f32
    %79 = vector.broadcast %cst_37 : f32 to vector<8x64xf32>
    %80 = arith.maximumf %78, %79 : vector<8x64xf32>
    %cst_38 = arith.constant dense<0.000000e+00> : vector<64xf32>
    %81 = vector.multi_reduction <add>, %71, %cst_38 [0] : vector<8x64xf32> to vector<64xf32>
    %82 = vector.shape_cast %81 : vector<64xf32> to vector<1x64xf32>
    %cst_39 = arith.constant 8.000000e+00 : f32
    %83 = vector.broadcast %cst_39 : f32 to vector<1x64xf32>
    %84 = arith.divf %82, %83 : vector<1x64xf32>
    %85 = vector.broadcast %13 : vector<1x1xf32> to vector<1x64xf32>
    %86 = arith.mulf %85, %84 : vector<1x64xf32>
    %cst_40 = arith.constant dense<0.000000e+00> : vector<1x64xf32>
    %87 = tpu.matmul %4, %80, %cst_40 {dimension_numbers = #tpu.dot_dimension_numbers<[1], [0], [0], [1], [0, 0, 1, 1], [], []>} : vector<1x8xf32>, vector<8x64xf32>, vector<1x64xf32> -> vector<1x64xf32>
    %88 = arith.addf %86, %87 : vector<1x64xf32>
    %89 = vector.broadcast %14 : vector<1x1xf32> to vector<1x64xf32>
    %90 = arith.addf %88, %89 : vector<1x64xf32>
    %cst_41 = arith.constant 0.000000e+00 : f32
    %91 = vector.broadcast %cst_41 : f32 to vector<1x64xf32>
    %92 = arith.maximumf %90, %91 : vector<1x64xf32>
    %93 = vector.broadcast %15 : vector<1x1xf32> to vector<1x64xf32>
    %94 = arith.mulf %92, %93 : vector<1x64xf32>
    %cst_42 = arith.constant dense<0.000000e+00> : vector<64xf32>
    %95 = vector.multi_reduction <add>, %94, %cst_42 [0] : vector<1x64xf32> to vector<64xf32>
    %96 = vector.shape_cast %95 : vector<64xf32> to vector<1x64xf32>
    %97 = vector.broadcast %16 : vector<1x1xf32> to vector<1x64xf32>
    %98 = arith.addf %96, %97 : vector<1x64xf32>
    %cst_43 = arith.constant 5.000000e-01 : f32
    %99 = vector.broadcast %cst_43 : f32 to vector<1x64xf32>
    %100 = arith.mulf %99, %98 : vector<1x64xf32>
    %101 = math.tanh %100 : vector<1x64xf32>
    %cst_44 = arith.constant 5.000000e-01 : f32
    %102 = vector.broadcast %cst_44 : f32 to vector<1x64xf32>
    %103 = arith.mulf %102, %101 : vector<1x64xf32>
    %cst_45 = arith.constant 5.000000e-01 : f32
    %104 = vector.broadcast %cst_45 : f32 to vector<1x64xf32>
    %105 = arith.addf %103, %104 : vector<1x64xf32>
    %106 = tpu.concatenate %68, %105 in 1 : vector<1x64xf32>, vector<1x64xf32> -> vector<1x128xf32>
    %107 = vector.broadcast %106 : vector<1x128xf32> to vector<64x128xf32>
    %108 = arith.mulf %107, %26 : vector<64x128xf32>
    %109 = vector.extract_strided_slice %108 {offsets = [0, 0], sizes = [64, 64], strides = [1, 1]} : vector<64x128xf32> to vector<64x64xf32>
    %cst_46 = arith.constant dense<0.000000e+00> : vector<24x64xf32>
    %110 = tpu.matmul %5, %109, %cst_46 {dimension_numbers = #tpu.dot_dimension_numbers<[1], [1], [0], [0], [0, 0, 1, 0], [], []>} : vector<24x64xf32>, vector<64x64xf32>, vector<24x64xf32> -> vector<24x64xf32>
    %111 = vector.broadcast %17 : vector<24x1xf32> to vector<24x64xf32>
    %112 = arith.addf %110, %111 : vector<24x64xf32>
    %cst_47 = arith.constant 0.000000e+00 : f32
    %113 = vector.broadcast %cst_47 : f32 to vector<24x64xf32>
    %114 = arith.maximumf %112, %113 : vector<24x64xf32>
    %115 = vector.extract_strided_slice %114 {offsets = [0, 0], sizes = [8, 64], strides = [1, 1]} : vector<24x64xf32> to vector<8x64xf32>
    %116 = vector.extract_strided_slice %114 {offsets = [8, 0], sizes = [8, 64], strides = [1, 1]} : vector<24x64xf32> to vector<8x64xf32>
    %117 = vector.extract_strided_slice %114 {offsets = [16, 0], sizes = [8, 64], strides = [1, 1]} : vector<24x64xf32> to vector<8x64xf32>
    %cst_48 = arith.constant dense<0.000000e+00> : vector<8x8xf32>
    %118 = tpu.matmul %116, %7, %cst_48 {dimension_numbers = #tpu.dot_dimension_numbers<[1], [0], [0], [1], [0, 0, 1, 1], [], []>} : vector<8x64xf32>, vector<64x8xf32>, vector<8x8xf32> -> vector<8x8xf32>
    %cst_49 = arith.constant dense<0.000000e+00> : vector<8x8xf32>
    %119 = tpu.matmul %115, %8, %cst_49 {dimension_numbers = #tpu.dot_dimension_numbers<[1], [0], [0], [1], [0, 0, 1, 1], [], []>} : vector<8x64xf32>, vector<64x8xf32>, vector<8x8xf32> -> vector<8x8xf32>
    %cst_50 = arith.constant dense<0.000000e+00> : vector<64x8xf32>
    %120 = tpu.matmul %115, %118, %cst_50 {dimension_numbers = #tpu.dot_dimension_numbers<[0], [0], [1], [1], [0, 1, 1, 1], [], []>} : vector<8x64xf32>, vector<8x8xf32>, vector<64x8xf32> -> vector<64x8xf32>
    %cst_51 = arith.constant dense<0.000000e+00> : vector<64x8xf32>
    %121 = tpu.matmul %116, %119, %cst_51 {dimension_numbers = #tpu.dot_dimension_numbers<[0], [0], [1], [1], [0, 1, 1, 1], [], []>} : vector<8x64xf32>, vector<8x8xf32>, vector<64x8xf32> -> vector<64x8xf32>
    %122 = arith.addf %120, %121 : vector<64x8xf32>
    %123 = vector.broadcast %19 : vector<1x8xf32> to vector<64x8xf32>
    %124 = arith.addf %122, %123 : vector<64x8xf32>
    %cst_52 = arith.constant 0.000000e+00 : f32
    %125 = vector.broadcast %cst_52 : f32 to vector<64x8xf32>
    %126 = arith.maximumf %124, %125 : vector<64x8xf32>
    %cst_53 = arith.constant dense<0.000000e+00> : vector<64x1xf32>
    %127 = tpu.matmul %117, %24, %cst_53 {dimension_numbers = #tpu.dot_dimension_numbers<[0], [0], [1], [1], [0, 1, 1, 1], [], []>} : vector<8x64xf32>, vector<8x1xf32>, vector<64x1xf32> -> vector<64x1xf32>
    %128 = vector.broadcast %20 : vector<1x1xf32> to vector<64x1xf32>
    %129 = arith.mulf %127, %128 : vector<64x1xf32>
    %cst_54 = arith.constant dense<0.000000e+00> : vector<64x1xf32>
    %130 = tpu.matmul %126, %9, %cst_54 {dimension_numbers = #tpu.dot_dimension_numbers<[1], [0], [0], [1], [0, 0, 1, 1], [], []>} : vector<64x8xf32>, vector<8x1xf32>, vector<64x1xf32> -> vector<64x1xf32>
    %131 = arith.addf %129, %130 : vector<64x1xf32>
    %132 = vector.broadcast %21 : vector<1x1xf32> to vector<64x1xf32>
    %133 = arith.addf %131, %132 : vector<64x1xf32>
    %cst_55 = arith.constant 0.000000e+00 : f32
    %134 = vector.broadcast %cst_55 : f32 to vector<64x1xf32>
    %135 = arith.maximumf %133, %134 : vector<64x1xf32>
    %136 = vector.broadcast %22 : vector<1x1xf32> to vector<64x1xf32>
    %137 = arith.mulf %135, %136 : vector<64x1xf32>
    %cst_56 = arith.constant dense<0.000000e+00> : vector<64xf32>
    %138 = vector.multi_reduction <add>, %137, %cst_56 [1] : vector<64x1xf32> to vector<64xf32>
    %139 = vector.shape_cast %138 : vector<64xf32> to vector<64x1xf32>
    %140 = vector.broadcast %23 : vector<1x1xf32> to vector<64x1xf32>
    %141 = arith.addf %139, %140 : vector<64x1xf32>
    %cst_57 = arith.constant 5.000000e-01 : f32
    %142 = vector.broadcast %cst_57 : f32 to vector<64x1xf32>
    %143 = arith.mulf %142, %141 : vector<64x1xf32>
    %144 = math.tanh %143 : vector<64x1xf32>
    %cst_58 = arith.constant 5.000000e-01 : f32
    %145 = vector.broadcast %cst_58 : f32 to vector<64x1xf32>
    %146 = arith.mulf %145, %144 : vector<64x1xf32>
    %cst_59 = arith.constant 5.000000e-01 : f32
    %147 = vector.broadcast %cst_59 : f32 to vector<64x1xf32>
    %148 = arith.addf %146, %147 : vector<64x1xf32>
    %149 = vector.shape_cast %148 : vector<64x1xf32> to vector<64x1xf32>
    %150 = vector.broadcast %149 : vector<64x1xf32> to vector<64x64xf32>
    %151 = vector.extract_strided_slice %108 {offsets = [0, 64], sizes = [64, 64], strides = [1, 1]} : vector<64x128xf32> to vector<64x64xf32>
    %cst_60 = arith.constant dense<0.000000e+00> : vector<24x64xf32>
    %152 = tpu.matmul %5, %151, %cst_60 {dimension_numbers = #tpu.dot_dimension_numbers<[1], [1], [0], [0], [0, 0, 1, 0], [], []>} : vector<24x64xf32>, vector<64x64xf32>, vector<24x64xf32> -> vector<24x64xf32>
    %153 = vector.broadcast %17 : vector<24x1xf32> to vector<24x64xf32>
    %154 = arith.addf %152, %153 : vector<24x64xf32>
    %cst_61 = arith.constant 0.000000e+00 : f32
    %155 = vector.broadcast %cst_61 : f32 to vector<24x64xf32>
    %156 = arith.maximumf %154, %155 : vector<24x64xf32>
    %157 = vector.extract_strided_slice %156 {offsets = [0, 0], sizes = [8, 64], strides = [1, 1]} : vector<24x64xf32> to vector<8x64xf32>
    %158 = vector.extract_strided_slice %156 {offsets = [8, 0], sizes = [8, 64], strides = [1, 1]} : vector<24x64xf32> to vector<8x64xf32>
    %159 = vector.extract_strided_slice %156 {offsets = [16, 0], sizes = [8, 64], strides = [1, 1]} : vector<24x64xf32> to vector<8x64xf32>
    %cst_62 = arith.constant dense<0.000000e+00> : vector<8x8xf32>
    %160 = tpu.matmul %158, %7, %cst_62 {dimension_numbers = #tpu.dot_dimension_numbers<[1], [0], [0], [1], [0, 0, 1, 1], [], []>} : vector<8x64xf32>, vector<64x8xf32>, vector<8x8xf32> -> vector<8x8xf32>
    %cst_63 = arith.constant dense<0.000000e+00> : vector<8x8xf32>
    %161 = tpu.matmul %157, %8, %cst_63 {dimension_numbers = #tpu.dot_dimension_numbers<[1], [0], [0], [1], [0, 0, 1, 1], [], []>} : vector<8x64xf32>, vector<64x8xf32>, vector<8x8xf32> -> vector<8x8xf32>
    %cst_64 = arith.constant dense<0.000000e+00> : vector<64x8xf32>
    %162 = tpu.matmul %157, %160, %cst_64 {dimension_numbers = #tpu.dot_dimension_numbers<[0], [0], [1], [1], [0, 1, 1, 1], [], []>} : vector<8x64xf32>, vector<8x8xf32>, vector<64x8xf32> -> vector<64x8xf32>
    %cst_65 = arith.constant dense<0.000000e+00> : vector<64x8xf32>
    %163 = tpu.matmul %158, %161, %cst_65 {dimension_numbers = #tpu.dot_dimension_numbers<[0], [0], [1], [1], [0, 1, 1, 1], [], []>} : vector<8x64xf32>, vector<8x8xf32>, vector<64x8xf32> -> vector<64x8xf32>
    %164 = arith.addf %162, %163 : vector<64x8xf32>
    %165 = vector.broadcast %19 : vector<1x8xf32> to vector<64x8xf32>
    %166 = arith.addf %164, %165 : vector<64x8xf32>
    %cst_66 = arith.constant 0.000000e+00 : f32
    %167 = vector.broadcast %cst_66 : f32 to vector<64x8xf32>
    %168 = arith.maximumf %166, %167 : vector<64x8xf32>
    %cst_67 = arith.constant dense<0.000000e+00> : vector<64x1xf32>
    %169 = tpu.matmul %159, %24, %cst_67 {dimension_numbers = #tpu.dot_dimension_numbers<[0], [0], [1], [1], [0, 1, 1, 1], [], []>} : vector<8x64xf32>, vector<8x1xf32>, vector<64x1xf32> -> vector<64x1xf32>
    %170 = vector.broadcast %20 : vector<1x1xf32> to vector<64x1xf32>
    %171 = arith.mulf %169, %170 : vector<64x1xf32>
    %cst_68 = arith.constant dense<0.000000e+00> : vector<64x1xf32>
    %172 = tpu.matmul %168, %9, %cst_68 {dimension_numbers = #tpu.dot_dimension_numbers<[1], [0], [0], [1], [0, 0, 1, 1], [], []>} : vector<64x8xf32>, vector<8x1xf32>, vector<64x1xf32> -> vector<64x1xf32>
    %173 = arith.addf %171, %172 : vector<64x1xf32>
    %174 = vector.broadcast %21 : vector<1x1xf32> to vector<64x1xf32>
    %175 = arith.addf %173, %174 : vector<64x1xf32>
    %cst_69 = arith.constant 0.000000e+00 : f32
    %176 = vector.broadcast %cst_69 : f32 to vector<64x1xf32>
    %177 = arith.maximumf %175, %176 : vector<64x1xf32>
    %178 = vector.broadcast %22 : vector<1x1xf32> to vector<64x1xf32>
    %179 = arith.mulf %177, %178 : vector<64x1xf32>
    %cst_70 = arith.constant dense<0.000000e+00> : vector<64xf32>
    %180 = vector.multi_reduction <add>, %179, %cst_70 [1] : vector<64x1xf32> to vector<64xf32>
    %181 = vector.shape_cast %180 : vector<64xf32> to vector<64x1xf32>
    %182 = vector.broadcast %23 : vector<1x1xf32> to vector<64x1xf32>
    %183 = arith.addf %181, %182 : vector<64x1xf32>
    %cst_71 = arith.constant 5.000000e-01 : f32
    %184 = vector.broadcast %cst_71 : f32 to vector<64x1xf32>
    %185 = arith.mulf %184, %183 : vector<64x1xf32>
    %186 = math.tanh %185 : vector<64x1xf32>
    %cst_72 = arith.constant 5.000000e-01 : f32
    %187 = vector.broadcast %cst_72 : f32 to vector<64x1xf32>
    %188 = arith.mulf %187, %186 : vector<64x1xf32>
    %cst_73 = arith.constant 5.000000e-01 : f32
    %189 = vector.broadcast %cst_73 : f32 to vector<64x1xf32>
    %190 = arith.addf %188, %189 : vector<64x1xf32>
    %191 = vector.shape_cast %190 : vector<64x1xf32> to vector<64x1xf32>
    %192 = vector.broadcast %191 : vector<64x1xf32> to vector<64x64xf32>
    %193 = tpu.concatenate %150, %192 in 1 : vector<64x64xf32>, vector<64x64xf32> -> vector<64x128xf32>
    %194 = arith.mulf %193, %108 : vector<64x128xf32>
    %c0_74 = arith.constant 0 : index
    %c0_75 = arith.constant 0 : index
    %c0_76 = arith.constant 0 : index
    %195 = vector.load %arg10[%c0_74, %c0_75, %c0_76] : memref<1x64x128xf32, #tpu.memory_space<vmem>>, vector<1x64x128xf32>
    %196 = vector.shape_cast %195 : vector<1x64x128xf32> to vector<64x128xf32>
    %197 = vector.shape_cast %194 : vector<64x128xf32> to vector<1x64x128xf32>
    tpu.vector_store %arg10[%c0_74, %c0_75, %c0_76], %197 {strides = array<i32>} : memref<1x64x128xf32, #tpu.memory_space<vmem>>, vector<1x64x128xf32>,
    return
  }
  func.func @transform_0(%arg0: i32) -> (i32, i32, i32) {
    %c0_i32 = arith.constant 0 : i32
    %c0_i32_0 = arith.constant 0 : i32
    %c0_i32_1 = arith.constant 0 : i32
    return %arg0, %c0_i32, %c0_i32_0 : i32, i32, i32
  }
  func.func @transform_1(%arg0: i32) -> (i32, i32) {
    %c0_i32 = arith.constant 0 : i32
    %c0_i32_0 = arith.constant 0 : i32
    %c0_i32_1 = arith.constant 0 : i32
    return %c0_i32, %c0_i32_0 : i32, i32
  }
  func.func @transform_2(%arg0: i32) -> (i32, i32) {
    %c0_i32 = arith.constant 0 : i32
    %c0_i32_0 = arith.constant 0 : i32
    %c0_i32_1 = arith.constant 0 : i32
    return %c0_i32, %c0_i32_0 : i32, i32
  }
  func.func @transform_3(%arg0: i32) -> (i32, i32) {
    %c0_i32 = arith.constant 0 : i32
    %c0_i32_0 = arith.constant 0 : i32
    %c0_i32_1 = arith.constant 0 : i32
    return %c0_i32, %c0_i32_0 : i32, i32
  }
  func.func @transform_4(%arg0: i32) -> (i32, i32) {
    %c0_i32 = arith.constant 0 : i32
    %c0_i32_0 = arith.constant 0 : i32
    %c0_i32_1 = arith.constant 0 : i32
    return %c0_i32, %c0_i32_0 : i32, i32
  }
  func.func @transform_5(%arg0: i32) -> (i32, i32) {
    %c0_i32 = arith.constant 0 : i32
    %c0_i32_0 = arith.constant 0 : i32
    %c0_i32_1 = arith.constant 0 : i32
    return %c0_i32, %c0_i32_0 : i32, i32
  }
  func.func @transform_6(%arg0: i32) -> (i32, i32) {
    %c0_i32 = arith.constant 0 : i32
    %c0_i32_0 = arith.constant 0 : i32
    %c0_i32_1 = arith.constant 0 : i32
    return %c0_i32, %c0_i32_0 : i32, i32
  }
  func.func @transform_7(%arg0: i32) -> (i32, i32) {
    %c0_i32 = arith.constant 0 : i32
    %c0_i32_0 = arith.constant 0 : i32
    %c0_i32_1 = arith.constant 0 : i32
    return %c0_i32, %c0_i32_0 : i32, i32
  }
  func.func @transform_8(%arg0: i32) -> (i32, i32) {
    %c0_i32 = arith.constant 0 : i32
    %c0_i32_0 = arith.constant 0 : i32
    %c0_i32_1 = arith.constant 0 : i32
    return %c0_i32, %c0_i32_0 : i32, i32
  }
  func.func @transform_9(%arg0: i32) -> (i32, i32, i32) {
    %c0_i32 = arith.constant 0 : i32
    %c0_i32_0 = arith.constant 0 : i32
    %c0_i32_1 = arith.constant 0 : i32
    return %arg0, %c0_i32, %c0_i32_0 : i32, i32, i32
  }
}

</mosaic_0001>

<bundles_post_ra>
// kernel: tpu_custom_call.1
= control target key start
LH: loop header
LB: loop body
LE: loop exit
PB: predicated region body
PF: predicated region fallthrough
CT: control target
= control target key end

     0   :  { %v4164_v3 = vmov 0.0|0.0   ;;  %vm4165_vm0 = vmmov 0   ;;  %v4166_v6 = vmov 0.0   ;;  %v4167_v7 = vmov 0   ;;  %s4951_s0 = inlined_call_operand.vmem [shape: f32[1,64,128], index: 0, kind: input, shape index: {}]   ;;  %s4952_s1 = inlined_call_operand.vmem [shape: f32[24,64], index: 1, kind: input, shape index: {}]   ;;  %s4953_s2 = inlined_call_operand.vmem [shape: f32[128,8], index: 2, kind: input, shape index: {}]   ;;  %s4954_s3 = inlined_call_operand.vmem [shape: f32[1,8], index: 3, kind: input, shape index: {}]   ;;  %s4955_s4 = inlined_call_operand.vmem [shape: f32[24,64], index: 4, kind: input, shape index: {}]   ;;  %s4956_s5 = inlined_call_operand.vmem [shape: f32[128,8], index: 5, kind: input, shape index: {}]   ;;  %s4957_s6 = inlined_call_operand.vmem [shape: f32[8,1], index: 6, kind: input, shape index: {}]   ;;  %s4958_s7 = inlined_call_operand.vmem [shape: f32[60,1], index: 7, kind: input, shape index: {}]   ;;  %s4959_s8 = inlined_call_operand.vmem [shape: f32[1,12], index: 8, kind: input, shape index: {}]   ;;  %s4960_s9 = inlined_call_operand.hbm [shape: f32[1,64,128], index: 9, kind: output, shape index: {}]  }
   0x1   :  { %v4230_v0 = vld [vmem:[%s4951_s0] sm:$0xff]  ;;  %v4235_v1 = vld [vmem:[%s4951_s0 + $0x8] sm:$0xff]  ;;  %v4240_v2 = vld [vmem:[%s4951_s0 + $0x10] sm:$0xff]  ;;  %3913 = vmatprep.subr.bf16.mxu0 %v4164_v3  ;;  %3560 = vmatprep.mubr.msk.f32.mxu0 %vm4165_vm0, %v4166_v6 }
   0x2   :  { %v3914_v4 = vpack.c.bf16 %v4235_v1, %v4230_v0  ;;  %v4248_v5 = vld [vmem:[%s4951_s0 + $0x18] sm:$0xff]  ;;  %4082 = vset.pattern.permute.xlu0 %v4167_v7  ;;  %3925 = vmatprep.subr.bf16.mxu1 %v4164_v3  ;;  %v73_v9 = vld [vmem:[%s4958_s7] sm:$0xff]  ;;  %v4270_v11 = vld [vmem:[%s4951_s0 + $0x28] sm:$0xff] }
   0x3   :  { %v3917_v8 = vpack.c.bf16 %v4248_v5, %v4240_v2  ;;  %3585 = vmatprep.mubr.msk.f32.mxu1 %vm4165_vm0, %v4166_v6  ;;  %v4265_v10 = vld [vmem:[%s4951_s0 + $0x20] sm:$0xff]  ;;  %92 = vperm.xlu0 %4082, %v73_v9   ;;  %v74_v12 = vld [vmem:[%s4958_s7 + $0x8] sm:$0xff] }
   0x4   :  { %3915 = vmatpush3.bf16.msra.mxu0 %v3914_v4  ;;  %v36_v13 = vld [vmem:[%s4953_s2] sm:$0xff]  ;;  %v37_v14 = vld [vmem:[%s4953_s2 + $0x8] sm:$0xff] }
   0x5   :  { %3916 = vmatprep.subr.bf16.mxu0 %v4164_v3  ;;  %v4281_v15 = vpack.c.bf16 %v37_v14, %v36_v13 }
   0x6   :  { %14 = vsyncpa [#allocation3], 0  ;;  %v3920_v16 = vpack.c.bf16 %v4270_v11, %v4265_v10  ;;  %v38_v17 = vld [vmem:[%s4953_s2 + $0x10] sm:$0xff]  ;;  %v39_v18 = vld [vmem:[%s4953_s2 + $0x18] sm:$0xff]  ;;  %vm105_vm1 = vcmask 523264   ;;  %s4168_s24 = smov 64  }
   0x7   :  { %v4295_v19 = vld [vmem:[%s4951_s0 + $0x30] sm:$0xff]  ;;  %v4300_v20 = vld [vmem:[%s4951_s0 + $0x38] sm:$0xff]  ;;  %97 = vperm.xlu0 %4082, %v74_v12   ;;  %3927 = vmatpush3.bf16.msra.mxu1 %v4281_v15  ;;  %v4306_v22 = vpack.c.bf16 %v39_v18, %v38_v17  ;;  %v44_v24 = vld [vmem:[%s4953_s2 + $0x40] sm:$0xff]  ;;  %vm376_vm2 = vcmask 64512   ;;  %vm1028_vm3 = vcmask 1048064   ;;  %vm1147_vm5 = vcmask 1043456  }
   0x8   :  { %3918 = vmatpush3.bf16.msra.mxu0 %v3917_v8  ;;  %v76_v21 = vld [vmem:[%s4958_s7 + $0x18] sm:$0xff]  ;;  %3928 = vmatprep.subr.bf16.mxu1 %v4164_v3  ;;  %v3923_v23 = vpack.c.bf16 %v4300_v20, %v4295_v19  ;;  %v45_v25 = vld [vmem:[%s4953_s2 + $0x48] sm:$0xff]  ;;  %v33_v26 = vld [vmem:[%s4952_s1] sm:$0xff]  ;;  %s4171_s25 = smov 118   ;;  %s4172_s26 = smov 117  }
   0x9   :  { %3919 = vmatprep.subr.bf16.mxu0 %v4164_v3  ;;  %v3938_v27 = vpack.c.bf16 %v45_v25, %v44_v24  ;;  %v46_v28 = vld [vmem:[%s4953_s2 + $0x50] sm:$0xff]  ;;  %v47_v29 = vld [vmem:[%s4953_s2 + $0x58] sm:$0xff]  ;;  %v34_v30 = vld [vmem:[%s4952_s1 + $0x8] sm:$0xff]  ;;  %s4173_s27 = smov 119  }
   0xa   :  { %v3941_v31 = vpack.c.bf16 %v47_v29, %v46_v28  ;;  %v48_v32 = vld [vmem:[%s4953_s2 + $0x60] sm:$0xff]  ;;  %v49_v33 = vld [vmem:[%s4953_s2 + $0x68] sm:$0xff]  ;;  %v35_v37 = vld [vmem:[%s4952_s1 + $0x10] sm:$0xff] }
   0xb   :  { %557 = vperm.xlu0 %4082, %v76_v21   ;;  %3930 = vmatpush3.bf16.msra.mxu1 %v4306_v22  ;;  %v3944_v34 = vpack.c.bf16 %v49_v33, %v48_v32  ;;  %v40_v35 = vld [vmem:[%s4953_s2 + $0x20] sm:$0xff]  ;;  %v41_v36 = vld [vmem:[%s4953_s2 + $0x28] sm:$0xff]  ;;  %v50_v39 = vld [vmem:[%s4953_s2 + $0x70] sm:$0xff] }
   0xc   :  { %3921 = vmatpush3.bf16.msra.mxu0 %v3920_v16  ;;  %3931 = vmatprep.subr.bf16.mxu1 %v4164_v3  ;;  %v4357_v38 = vpack.c.bf16 %v41_v36, %v40_v35  ;;  %v51_v40 = vld [vmem:[%s4953_s2 + $0x78] sm:$0xff]  ;;  %v42_v42 = vld [vmem:[%s4953_s2 + $0x30] sm:$0xff]  ;;  %v52_v24 = vld [vmem:[%s4954_s3] sm:$0x1]  ;;  %s4174_s3 = smov [#allocation2]  }
   0xd   :  { %3922 = vmatprep.subr.bf16.mxu0 %v4164_v3  ;;  %v3947_v41 = vpack.c.bf16 %v51_v40, %v50_v39  ;;  %v43_v43 = vld [vmem:[%s4953_s2 + $0x38] sm:$0xff]  ;;  %v75_v12 = vld [vmem:[%s4958_s7 + $0x10] sm:$0xff]  ;;  %v77_v29 = vld [vmem:[%s4958_s7 + $0x20] sm:$0xff] }
   0xe   :  { %v4376_v44 = vpack.c.bf16 %v43_v43, %v42_v42  ;;  %vm4505_vm4 = vmpackc.low %vm105_vm1, %vm105_vm1 }
   0xf   :  { %3933 = vmatpush3.bf16.msra.mxu1 %v4357_v38 }
  0x10   :  { %3924 = vmatpush3.bf16.msra.mxu0 %v3923_v23  ;;  %3934 = vmatprep.subr.bf16.mxu1 %v4164_v3 }
  0x11   :  { %3937 = vmatprep.subr.bf16.mxu0 %v4164_v3 }
  0x13   :  { %3561 = vmatmul.mubr.msk.f32.vlgmr.msra.gmra.mrb[0].mxu0 %vm105_vm1, %v33_v26  ;;  %3936 = vmatpush3.bf16.msra.mxu1 %v4376_v44 }
  0x14   :  { %3563 = vmatprep.mubr.msk.f32.mxu0 %vm4165_vm0, %v4166_v6  ;;  %3939 = vmatpush3.bf16.msra.mxu0 %v3938_v27 }
  0x15   :  { %3940 = vmatprep.subr.bf16.mxu0 %v4164_v3  ;;  %3607 = vmatprep.subr.mxu1 %v4166_v6 }
  0x17   :  { %3564 = vmatmul.mubr.msk.f32.gmra.mrb[2].mxu0 %vm105_vm1, %v34_v30 }
  0x18   :  { %3942 = vmatpush3.bf16.msra.mxu0 %v3941_v31  ;;  %3566 = vmatprep.mubr.msk.f32.mxu0 %vm4165_vm0, %v4166_v6 }
  0x19   :  { %3943 = vmatprep.subr.bf16.mxu0 %v4164_v3 }
  0x1b   :  { %3567 = vmatmul.mubr.msk.f32.gmra.mrb[4].mxu0 %vm105_vm1, %v35_v37 }
  0x1c   :  { %3945 = vmatpush3.bf16.msra.mxu0 %v3944_v34  ;;  %3604 = vmatprep.mubr.msk.f32.mxu0 %vm4165_vm0, %v4166_v6 }
  0x1d   :  { %3946 = vmatprep.subr.bf16.mxu0 %v4164_v3 }
  0x20   :  { %3948 = vmatpush3.bf16.msra.mxu0 %v3947_v41 }
  0x21   :  { %3961 = vmatprep.subr.bf16.mxu0 %v4164_v3 }
  0x82   :  { %v93_v45 = vpop.permute.xlu0 %92 }
  0x86   :  { %v98_v50 = vpop.permute.xlu0 %97 }
  0x8a   :  { %v4395_v57 = vpop.permute.xlu0 %557 }
  0xe6   :  { %v181_v46 = vpop.f32.mrb[0].mxu0 }
  0xe7   :  { %v182_v47 = vadd.f32 %v181_v46, %v93_v45  ;;  %v3562_v48 = vpop.f32.mrb[1].mxu0 }
  0xe9   :  { %v195_v49 = vmax.f32 %v182_v47, 0.0 }
  0xea   :  { %v186_v51 = vpop.f32.mrb[2].mxu0 }
  0xeb   :  { %v187_v52 = vadd.f32 %v186_v51, %v98_v50  ;;  %740 = vrot.lane.b32.xlu0 %v195_v49, %s4168_s24  ;;  %v3565_v53 = vpop.f32.mrb[3].mxu0  ;;  %3605 = vmatmul.mubr.msk.f32.vlgmr.msra.gmra.mrb[6].mxu0 %vm105_vm1, %v195_v49 }
  0xec   :  { %3963 = vmatpush3.bf16.msra.mxu0 %v3938_v27  ;;  %3657 = vmatprep.mubr.msk.f32.mxu0 %vm4165_vm0, %v4166_v6  ;;  %v78_v53 = vld [vmem:[%s4958_s7 + $0x28] sm:$0xff] }
  0xed   :  { %v196_v54 = vmax.f32 %v187_v52, 0.0  ;;  %3964 = vmatprep.subr.bf16.mxu0 %v4164_v3 }
  0xee   :  { %v4393_v55 = vpop.f32.mrb[4].mxu0 }
  0xef   :  { %3586 = vmatmul.mubr.msk.f32.vlgmr.msra.gmra.mrb[0].mxu1 %vm105_vm1, %v196_v54  ;;  %v3568_v56 = vpop.f32.mrb[5].mxu0 }
  0xf0   :  { %3608 = vmatpush3.msra.mxu1 %v196_v54  ;;  %3966 = vmatpush3.bf16.msra.mxu0 %v3941_v31 }
  0xf1   :  { %3967 = vmatprep.subr.bf16.mxu0 %v4164_v3  ;;  %3609 = vmatprep.mubr.msk.f32.mxu1 %vm4165_vm0, %v4166_v6 }
  0xf2   :  { %3612 = vmatprep.subr.mxu1 %v4166_v6 }
  0xf4   :  { %3969 = vmatpush3.bf16.msra.mxu0 %v3944_v34 }
  0xf5   :  { %3970 = vmatprep.subr.bf16.mxu0 %v4164_v3 }
  0xf8   :  { %3972 = vmatpush3.bf16.msra.mxu0 %v3947_v41 }
  0xf9   :  { %3665 = vmatprep.subr.mxu0 %v4166_v6 }
 0x15d   :  { %v741_v58 = vpop.permute.xlu0 %740 }
 0x15e   :  { %3658 = vmatmul.mubr.msk.f32.vlgmr.msra.gmra.mrb[8].mxu0 %vm105_vm1, %v741_v58 }
 0x15f   :  { %3666 = vmatpush3.msra.mxu0 %v741_v58  ;;  %3667 = vmatprep.mubr.msk.f32.mxu0 %vm4165_vm0, %v4166_v6 }
 0x160   :  { %3973 = vmatprep.subr.bf16.mxu0 %v4164_v3 }
 0x1be   :  { %v340_v59 = vpop.f32.mrb[6].mxu0 }
 0x1bf   :  { %344 = vxpose.xlu1.b32.start.end [1/1] (short) (narrow) %v340_v59, 8  ;;  %v3606_v60 = vpop.f32.mrb[7].mxu0 }
 0x1c2   :  { %v267_v61 = vpop.f32.mrb[0].mxu1 }
 0x1c3   :  { %v3587_v62 = vpop.f32.mrb[1].mxu1  ;;  %450 = vxpose.xlu1.b32.start.end [1/1] (short) (narrow) %v267_v61, 8 }
 0x1e1   :  { %666 = vrot.lane.b32.xlu1 %v196_v54, %s4168_s24  ;;  %v79_v54 = vld [vmem:[%s4958_s7 + $0x30] sm:$0xff] }
 0x231   :  { %v810_v63 = vpop.f32.mrb[8].mxu0 }
 0x232   :  { %814 = vxpose.xlu0.b32.start.end [1/1] (short) (narrow) %v810_v63, 8  ;;  %v3659_v4 = vpop.f32.mrb[9].mxu0 }
 0x23f   :  { %v360_v8 = vpop.trf.xlu1 }
 0x240   :  { %3610 = vmatmul.mubr.msk.f32.vlgmr.msra.gmra.mrb[2].mxu1 %vm376_vm2, %v360_v8 }
 0x241   :  { %3613 = vmatpush3.msra.mxu1 %v195_v49  ;;  %3614 = vmatprep.mubr.msk.f32.mxu1 %vm4165_vm0, %v4166_v6 }
 0x242   :  { %3617 = vmatprep.subr.mxu1 %v4166_v6 }
 0x243   :  { %v466_v9 = vpop.trf.xlu1 }
 0x244   :  { %3615 = vmatmul.mubr.msk.f32.vlgmr.msra.gmra.mrb[4].mxu1 %vm376_vm2, %v466_v9 }
 0x245   :  { %3619 = vmatprep.mubr.msk.f32.mxu1 %vm4165_vm0, %v4166_v6 }
 0x253   :  { %v667_v25 = vpop.permute.xlu1 %666 }
 0x25b   :  { %102 = vperm.xlu0 %4082, %v75_v12  }
 0x313   :  { %v446_v13 = vpop.f32.mrb[2].mxu1 }
 0x314   :  { %v3611_v14 = vpop.f32.mrb[3].mxu1 }
 0x317   :  { %v551_v16 = vpop.f32.mrb[4].mxu1 }
 0x318   :  { %v552_v17 = vadd.f32 %v551_v16, %v446_v13  ;;  %v3616_v18 = vpop.f32.mrb[5].mxu1 }
 0x31a   :  { %v560_v21 = vadd.f32 %v4395_v57, %v552_v17 }
 0x31c   :  { %v561_v23 = vmax.f32 %v560_v21, 0.0 }
 0x31e   :  { %3618 = vmatpush3.msra.mxu1 %v561_v23 }
 0x31f   :  { %3620 = vmatmul.mubr.msk.f32.vlgmr.msra.gmra.mrb[6].mxu1 %vm376_vm2, %v52_v24  ;;  %3949 = vmatprep.subr.bf16.mxu1 %v4164_v3 }
 0x320   :  { %3951 = vmatpush3.bf16.msra.mxu1 %v4281_v15  ;;  %3638 = vmatprep.mubr.msk.f32.mxu1 %vm4165_vm0, %v4166_v6  ;;  %v830_v15 = vpop.trf.xlu0 }
 0x321   :  { %3952 = vmatprep.subr.bf16.mxu1 %v4164_v3 }
 0x324   :  { %3954 = vmatpush3.bf16.msra.mxu1 %v4306_v22  ;;  %v103_v32 = vpop.permute.xlu0 %102 }
 0x325   :  { %3955 = vmatprep.subr.bf16.mxu1 %v4164_v3  ;;  %v192_v33 = vadd.f32 %v4393_v55, %v103_v32 }
 0x327   :  { %v197_v34 = vmax.f32 %v192_v33, 0.0 }
 0x328   :  { %3957 = vmatpush3.bf16.msra.mxu1 %v4357_v38 }
 0x329   :  { %3958 = vmatprep.subr.bf16.mxu1 %v4164_v3  ;;  %v562_v36 = vsel %vm105_vm1, %v197_v34, 0.0  ;;  %v1029_v55 = vsel %vm1028_vm3, %v197_v34, 0.0 }
 0x32a   :  { %v563_v37 = vrot.slane %v562_v36, 4  ;;  %v1030_v56 = vrot.slane %v1029_v55, 4 }
 0x32c   :  { %3960 = vmatpush3.bf16.msra.mxu1 %v4376_v44  ;;  %v564_v38 = vadd.f32 %v563_v37, %v562_v36  ;;  %v56_v36 = vld [vmem:[%s4956_s5] sm:$0xff]  ;;  %v57_v37 = vld [vmem:[%s4956_s5 + $0x8] sm:$0xff] }
 0x32d   :  { %3660 = vmatprep.subr.mxu1 %v4166_v6 }
 0x32e   :  { %v565_v39 = vrot.slane %v564_v38, 2 }
 0x32f   :  { %3639 = vmatmul.mubr.msk.f32.vlgmr.msra.gmra.mrb[8].mxu1 %vm105_vm1, %v667_v25 }
 0x330   :  { %3661 = vmatpush3.msra.mxu1 %v667_v25  ;;  %3662 = vmatprep.mubr.msk.f32.mxu1 %vm4165_vm0, %v4166_v6  ;;  %v566_v40 = vadd.f32 %v565_v39, %v564_v38  ;;  %v4470_v39 = vpack.c.bf16 %v57_v37, %v56_v36 }
 0x331   :  { %3670 = vmatprep.subr.mxu1 %v4166_v6 }
 0x333   :  { %3663 = vmatmul.mubr.msk.f32.vlgmr.msra.gmra.mrb[10].mxu1 %vm376_vm2, %v830_v15 }
 0x334   :  { %3672 = vmatprep.mubr.msk.f32.mxu1 %vm4165_vm0, %v4166_v6 }
 0x3f2   :  { %v646_v22 = vpop.f32.mrb[6].mxu1 }
 0x3f3   :  { %v3621_v26 = vpop.f32.mrb[7].mxu1 }
 0x3f4   :  { %v1123_v26 = vlaneseq }
 0x402   :  { %v736_v27 = vpop.f32.mrb[8].mxu1 }
 0x403   :  { %920 = vxpose.xlu1.b32.start.end [1/1] (short) (narrow) %v736_v27, 8  ;;  %v3640_v28 = vpop.f32.mrb[9].mxu1 }
 0x404   :  { %v1124_v28 = vshrl.u32 %v1123_v26, 7 }
 0x406   :  { %v916_v30 = vpop.f32.mrb[10].mxu1  ;;  %v1125_v32 = vsub.s32 0, %v1124_v28  ;;  %v69_v28 = vld [vmem:[%s4956_s5 + $0x68] sm:$0xff] }
 0x407   :  { %v3664_v31 = vpop.f32.mrb[11].mxu1 }
 0x421   :  { %4083 = vset.pattern.permute.xlu1 %v4167_v7  ;;  %v567_v7 = vrot.slane %v566_v40, 1 }
 0x422   :  { %573 = vperm.xlu1 %4083, %v77_v29  }
 0x423   :  { %v568_v41 = vadd.f32 %v567_v7, %v566_v40  ;;  %v58_v40 = vld [vmem:[%s4956_s5 + $0x10] sm:$0xff]  ;;  %v59_v7 = vld [vmem:[%s4956_s5 + $0x18] sm:$0xff] }
 0x425   :  { %v570_v42 = vmul.f32 0.125, %v568_v41 }
 0x483   :  { %v936_v35 = vpop.trf.xlu1 }
 0x484   :  { %3668 = vmatmul.mubr.msk.f32.vlgmr.msra.gmra.mrb[10].mxu0 %vm376_vm2, %v936_v35 }
 0x485   :  { %3691 = vmatprep.mubr.msk.f32.mxu0 %vm4165_vm0, %v4166_v6 }
 0x4a1   :  { %v4444_v43 = vpop.permute.xlu1 %573 }
 0x4a2   :  { %v576_v44 = vmul.f32 %v4444_v43, %v570_v42  ;;  %v651_v60 = vrot.slane %v4444_v43, 1  ;;  %v655_v4 = vrot.slane %v4444_v43, 2  ;;  %v659_v12 = vrot.slane %v4444_v43, 3 }
 0x4a4   :  { %v650_v45 = vadd.f32 %v646_v22, %v576_v44 }
 0x4a6   :  { %v653_v61 = vadd.f32 %v651_v60, %v650_v45 }
 0x4a8   :  { %v654_v63 = vmax.f32 %v653_v61, 0.0 }
 0x4aa   :  { %v657_v9 = vmul.f32 %v655_v4, %v654_v63  ;;  %v1148_v63 = vrot.slane %v4444_v43, 4 }
 0x4ac   :  { %v661_v17 = vadd.f32 %v659_v12, %v657_v9 }
 0x4ae   :  { %v662_v23 = vmul.f32 0.5, %v661_v17  ;;  %v65_v17 = vld [vmem:[%s4956_s5 + $0x48] sm:$0xff] }
 0x4b0   :  { %4104 = vtanh.f32 %v662_v23 }
 0x4ba   :  { %v4105_v27 = vpop.eup %4104 }
 0x4bb   :  { %v664_v29 = vmul.f32 0.5, %v4105_v27  ;;  %v68_v27 = vld [vmem:[%s4956_s5 + $0x60] sm:$0xff] }
 0x4bd   :  { %v665_v33 = vadd.f32 0.5, %v664_v29  ;;  %v4624_v29 = vpack.c.bf16 %v69_v28, %v68_v27 }
 0x557   :  { %v1022_v46 = vpop.f32.mrb[10].mxu0 }
 0x558   :  { %v1023_v47 = vadd.f32 %v1022_v46, %v916_v30  ;;  %v3669_v48 = vpop.f32.mrb[11].mxu0 }
 0x55a   :  { %v1026_v49 = vadd.f32 %v1023_v47, %v4395_v57  ;;  %v1031_v57 = vadd.f32 %v1030_v56, %v1029_v55  ;;  %v4495_v47 = vpack.c.bf16 %v59_v7, %v58_v40  ;;  %v61_v55 = vld [vmem:[%s4956_s5 + $0x28] sm:$0xff] }
 0x55c   :  { %v1027_v50 = vmax.f32 %v1026_v49, 0.0  ;;  %v1032_v58 = vrot.slane %v1031_v57, 2 }
 0x55e   :  { %3671 = vmatpush3.msra.mxu1 %v1027_v50  ;;  %v1033_v59 = vadd.f32 %v1032_v58, %v1031_v57  ;;  %v62_v57 = vld [vmem:[%s4956_s5 + $0x30] sm:$0xff]  ;;  %v63_v58 = vld [vmem:[%s4956_s5 + $0x38] sm:$0xff] }
 0x55f   :  { %3673 = vmatmul.mubr.msk.f32.vlgmr.msra.gmra.mrb[12].mxu1 %vm376_vm2, %v52_v24  ;;  %3989 = vmatprep.subr.bf16.mxu1 %v4164_v3 }
 0x560   :  { %3716 = vmatprep.mubr.msk.f32.mxu1 %vm4165_vm0, %v4166_v6  ;;  %v1034_v62 = vrot.slane %v1033_v59, 1  ;;  %3991 = vmatpush3.bf16.msra.mxu1 %v4470_v39 }
 0x561   :  { %3992 = vmatprep.subr.bf16.mxu1 %v4164_v3 }
 0x562   :  { %v1035_v8 = vadd.f32 %v1034_v62, %v1033_v59  ;;  %v4583_v59 = vpack.c.bf16 %v63_v58, %v62_v57 }
 0x564   :  { %v1036_v13 = vmul.f32 0.125, %v1035_v8  ;;  %3994 = vmatpush3.bf16.msra.mxu1 %v4495_v47 }
 0x565   :  { %3995 = vmatprep.subr.bf16.mxu1 %v4164_v3 }
 0x566   :  { %v1037_v14 = vmul.f32 %v1036_v13, %v4444_v43 }
 0x632   :  { %v1104_v51 = vpop.f32.mrb[12].mxu1 }
 0x633   :  { %1109 = vrot.lane.b32.xlu0 %v1104_v51, %s4168_s24  ;;  %v3674_v52 = vpop.f32.mrb[13].mxu1 }
 0x637   :  { %1137 = vperm.xlu0 %4082, %v78_v53   ;;  %v4545_v53 = vld [vmem:[%s4955_s4] sm:$0xff] }
 0x63b   :  { %1141 = vperm.xlu0 %4082, %v79_v54   ;;  %v60_v54 = vld [vmem:[%s4956_s5 + $0x20] sm:$0xff] }
 0x63c   :  { %v4573_v56 = vpack.c.bf16 %v61_v55, %v60_v54 }
 0x63e   :  { %3997 = vmatpush3.bf16.msra.mxu1 %v4573_v56 }
 0x63f   :  { %3998 = vmatprep.subr.bf16.mxu1 %v4164_v3 }
 0x642   :  { %4000 = vmatpush3.bf16.msra.mxu1 %v4583_v59 }
 0x643   :  { %4001 = vmatprep.subr.bf16.mxu1 %v4164_v3 }
 0x6a5   :  { %v1110_v16 = vpop.permute.xlu0 %1109 }
 0x6a6   :  { %v1112_v18 = vadd.f32 %v1110_v16, %v1037_v14  ;;  %v64_v16 = vld [vmem:[%s4956_s5 + $0x40] sm:$0xff] }
 0x6a8   :  { %v1113_v21 = vadd.f32 %v1112_v18, %v651_v60 }
 0x6aa   :  { %v1114_v24 = vmax.f32 %v1113_v21, 0.0 }
 0x6ac   :  { %v1115_v25 = vmul.f32 %v1114_v24, %v655_v4  ;;  %v4602_v24 = vpack.c.bf16 %v65_v17, %v64_v16 }
 0x6ae   :  { %v1117_v15 = vadd.f32 %v1115_v25, %v659_v12 }
 0x6b0   :  { %v1118_v22 = vmul.f32 0.5, %v1117_v15  ;;  %v66_v15 = vld [vmem:[%s4956_s5 + $0x50] sm:$0xff] }
 0x6b2   :  { %4106 = vtanh.f32 %v1118_v22  ;;  %v67_v22 = vld [vmem:[%s4956_s5 + $0x58] sm:$0xff] }
 0x6b3   :  { %v4612_v26 = vpack.c.bf16 %v67_v22, %v66_v15 }
 0x6b6   :  { %v1138_v60 = vpop.permute.xlu0 %1137 }
 0x6b7   :  { %v1149_v61 = vrot.slane %v1138_v60, 4 }
 0x6b9   :  { %v4589_v8 = vsel %vm1147_vm5, %v1148_v63, %v1149_v61 }
 0x6ba   :  { %v1142_v62 = vpop.permute.xlu0 %1141 }
 0x6bb   :  { %v1151_v4 = vrot.slane %v1142_v62, 4  ;;  %v4169_v62 = vmov 0.125  }
 0x6bc   :  { %v4107_v30 = vpop.eup %4106 }
 0x6bd   :  { %v1120_v31 = vmul.f32 0.5, %v4107_v30  ;;  %v4599_v18 = vsel %vm1147_vm5, %v1149_v61, %v1151_v4  ;;  %v70_v30 = vld [vmem:[%s4956_s5 + $0x70] sm:$0xff] }
 0x6bf   :  { %v1121_v34 = vadd.f32 0.5, %v1120_v31  ;;  %v71_v31 = vld [vmem:[%s4956_s5 + $0x78] sm:$0xff] }
 0x6c1   :  { %v1122_v35 = vsel %vm105_vm1, %v665_v33, %v1121_v34  ;;  %v80_v33 = vld [vmem:[%s4958_s7 + $0x38] sm:$0xf] }
 0x6c2   :  { %v1126_v38 = vrot.slane %v1122_v35, %v1125_v32  ;;  %v4634_v32 = vpack.c.bf16 %v71_v31, %v70_v30 }
 0x6c4   :  { %v4479_v41 = vmul.f32 %v1126_v38, %v4240_v2  ;;  %v4482_v42 = vmul.f32 %v1126_v38, %v4248_v5  ;;  %v4485_v44 = vmul.f32 %v1126_v38, %v4230_v0  ;;  %v4488_v45 = vmul.f32 %v1126_v38, %v4235_v1 }
 0x6c5   :  { %v4492_v46 = vmul.f32 %v1126_v38, %v4265_v10  ;;  %v4510_v10 = vmul.f32 %v1126_v38, %v4270_v11  ;;  %v4533_v50 = vmul.f32 %v1126_v38, %v4295_v19  ;;  %v4536_v51 = vmul.f32 %v1126_v38, %v4300_v20  ;;  %v4554_v19 = vld [vmem:[%s4955_s4 + $0x8] sm:$0xff]  ;;  %v4563_v20 = vld [vmem:[%s4955_s4 + $0x10] sm:$0xff]  ;;  %s3240_s4 = sshll.u32 %s4174_s3, 4  ;;  %s3241_s4 = int_to_ptr.vmem [resolvable:$true] %s3240_s4 }
 0x6c6   :  { %v4089_v2 = vpack.i.bf16 %v4482_v42, %v4479_v41  ;;  %v4084_v5 = vpack.i.bf16 %v4488_v45, %v4485_v44  ;;  %v3974_v0 = vpack.c.bf16 %v4488_v45, %v4485_v44  ;;  %v3978_v11 = vpack.c.bf16 %v4482_v42, %v4479_v41  ;;  %s4140_s28 = scalar_lea.vmem %s3241_s4, 1024  ;;  %p4145_p1 = scmp.lt.s32.totalorder %s3241_s4, %s3241_s4 }
 0x6c7   :  { %v4094_v48 = vpack.i.bf16 %v4510_v10, %v4492_v46  ;;  %v3982_v49 = vpack.c.bf16 %v4510_v10, %v4492_v46  ;;  %v3986_v52 = vpack.c.bf16 %v4536_v51, %v4533_v50  ;;  %v4099_v36 = vpack.i.bf16 %v4536_v51, %v4533_v50  ;;  %p4141_p0 = scmp.ne.s32.totalorder %s3241_s4, %s4140_s28  ;;  %p4146_p2 = scmp.lt.s32.totalorder %s4140_s28, %s4140_s28 }
 0x6c8   :  { %4090 = vrot.lane.b32.xlu1 %v4089_v2, %s4168_s24  ;;  %4085 = vrot.lane.b32.xlu0 %v4084_v5, %s4168_s24 }
 0x6c9   :  { %3976 = vmatpush3.bf16.xpose.msk.msra.mxu0 %vm4505_vm4, %v3974_v0  ;;  %p4147_p3 = por %p4146_p2, %p4145_p1 }
 0x6ca   :  { %3977 = vmatprep.subr.bf16.mxu0 %v4164_v3 }
 0x6cb   :  { %p4148_p4 = pnand %p4147_p3, %p4141_p0 }
 0x6cc   :  { %4095 = vrot.lane.b32.xlu1 %v4094_v48, %s4168_s24 }
 0x6d1   :  { %3980 = vmatpush3.bf16.xpose.msk.msra.mxu0 %vm4505_vm4, %v3978_v11 }
 0x6d2   :  { %3981 = vmatprep.subr.bf16.mxu0 %v4164_v3 }
 0x6d9   :  { %3984 = vmatpush3.bf16.xpose.msk.msra.mxu0 %vm4505_vm4, %v3982_v49 }
 0x6da   :  { %3985 = vmatprep.subr.bf16.mxu0 %v4164_v3 }
 0x6e1   :  { %3988 = vmatpush3.bf16.xpose.msk.msra.mxu0 %vm4505_vm4, %v3986_v52 }
 0x6e2   :  { %3766 = vmatprep.subr.mxu0 %v4169_v62 }
 0x6e8   :  { %3692 = vmatmul.mubr.msk.f32.vlgmr.msra.gmra.mrb[12].mxu0 %vm105_vm1, %v4545_v53 }
 0x6e9   :  { %3694 = vmatprep.mubr.msk.f32.mxu0 %vm4165_vm0, %v4166_v6  ;;  %3767 = vmatpush3.msra.mxu0 %v4169_v62 }
 0x6ec   :  { %3695 = vmatmul.mubr.msk.f32.gmra.mrb[14].mxu0 %vm105_vm1, %v4554_v19 }
 0x6ed   :  { %3697 = vmatprep.mubr.msk.f32.mxu0 %vm4165_vm0, %v4166_v6 }
 0x6f0   :  { %3698 = vmatmul.mubr.msk.f32.gmra.mrb[16].mxu0 %vm105_vm1, %v4563_v20 }
 0x73a   :  { %v4091_v37 = vpop.permute.xlu1 %4090  ;;  %v4086_v38 = vpop.permute.xlu0 %4085 }
 0x73b   :  { %v4093_v27 = vunpack.i.h.bf16 %v4091_v37  ;;  %v4092_v28 = vunpack.i.l.bf16 %v4091_v37 }
 0x73d   :  { %v4018_v30 = vpack.c.bf16 %v4093_v27, %v4092_v28 }
 0x73e   :  { %v4645_v7 = vpop.permute.xlu1 %4095 }
 0x73f   :  { %v4098_v31 = vunpack.i.h.bf16 %v4645_v7 }
 0x7bb   :  { %v1257_v9 = vpop.f32.mrb[12].mxu0 }
 0x7bc   :  { %v1258_v12 = vadd.f32 %v1257_v9, %v4589_v8  ;;  %v3693_v13 = vpop.f32.mrb[13].mxu0 }
 0x7be   :  { %v1271_v14 = vmax.f32 %v1258_v12, 0.0 }
 0x7bf   :  { %v1262_v43 = vpop.f32.mrb[14].mxu0 }
 0x7c0   :  { %v1263_v21 = vadd.f32 %v1262_v43, %v4599_v18  ;;  %1581 = vxpose.xlu1.b32.start.end [1/1] (short) (narrow) %v1271_v14, 64  ;;  %v3696_v23 = vpop.f32.mrb[15].mxu0 }
 0x7c1   :  { %v4088_v23 = vunpack.i.h.bf16 %v4086_v38 }
 0x7c2   :  { %v1272_v25 = vmax.f32 %v1263_v21, 0.0 }
 0x7c3   :  { %v1267_v34 = vpop.f32.mrb[16].mxu0 }
 0x7c4   :  { %1420 = vxpose.xlu0.b32.start.end [1/1] (short) (narrow) %v1272_v25, 64  ;;  %3717 = vmatmul.mubr.msk.f32.vlgmr.msra.gmra.mrb[14].mxu1 %vm105_vm1, %v1272_v25  ;;  %v3699_v35 = vpop.f32.mrb[17].mxu0  ;;  %v4087_v25 = vunpack.i.l.bf16 %v4086_v38 }
 0x7c5   :  { %4003 = vmatpush3.bf16.msra.mxu1 %v4602_v24  ;;  %3735 = vmatprep.mubr.msk.f32.mxu1 %vm4165_vm0, %v4166_v6 }
 0x7c6   :  { %4004 = vmatprep.subr.bf16.mxu1 %v4164_v3  ;;  %v4014_v22 = vpack.c.bf16 %v4088_v23, %v4087_v25 }
 0x7c9   :  { %4006 = vmatpush3.bf16.msra.mxu1 %v4612_v26 }
 0x7ca   :  { %4007 = vmatprep.subr.bf16.mxu1 %v4164_v3 }
 0x7cd   :  { %4009 = vmatpush3.bf16.msra.mxu1 %v4624_v29 }
 0x7ce   :  { %4010 = vmatprep.subr.bf16.mxu1 %v4164_v3 }
 0x7d1   :  { %4012 = vmatpush3.bf16.msra.mxu1 %v4634_v32 }
 0x7d4   :  { %3736 = vmatmul.mubr.msk.f32.vlgmr.msra.gmra.mrb[16].mxu1 %vm105_vm1, %v1271_v14 }
 0x7fa   :  { %1145 = vperm.xlu1 %4083, %v80_v33   ;;  %v4097_v33 = vunpack.i.l.bf16 %v4645_v7 }
 0x809   :  { %4100 = vrot.lane.b32.xlu0 %v4099_v36, %s4168_s24 }
 0x840   :  { %v1597_v2 = vpop.trf.xlu1 }
 0x844   :  { %v1436_v40 = vpop.trf.xlu0  ;;  %v1598_v5 = vpop.trf.xlu1 }
 0x845   :  { %3740 = vmatprep.mubr.msk.f32.mxu1 %vm376_vm2, %v1436_v40 }
 0x848   :  { %v1599_v0 = vpop.trf.xlu1  ;;  %v1437_v63 = vpop.trf.xlu0 }
 0x84c   :  { %v1600_v48 = vpop.trf.xlu1  ;;  %v1438_v9 = vpop.trf.xlu0 }
 0x850   :  { %v1601_v11 = vpop.trf.xlu1  ;;  %v1439_v14 = vpop.trf.xlu0 }
 0x854   :  { %v1602_v49 = vpop.trf.xlu1  ;;  %v1440_v16 = vpop.trf.xlu0 }
 0x858   :  { %v1603_v52 = vpop.trf.xlu1  ;;  %v1441_v21 = vpop.trf.xlu0 }
 0x85c   :  { %v1604_v54 = vpop.trf.xlu1 }
 0x879   :  { %v1146_v55 = vpop.permute.xlu1 %1145 }
 0x87a   :  { %v1153_v57 = vrot.slane %v1146_v55, 4 }
 0x87c   :  { %v4649_v58 = vsel %vm1147_vm5, %v1151_v4, %v1153_v57  ;;  %v1442_v4 = vpop.trf.xlu0 }
 0x87d   :  { %v1268_v60 = vadd.f32 %v1267_v34, %v4649_v58  ;;  %v4022_v34 = vpack.c.bf16 %v4098_v31, %v4097_v33 }
 0x87f   :  { %v1273_v61 = vmax.f32 %v1268_v60, 0.0 }
 0x880   :  { %v1443_v15 = vpop.trf.xlu0 }
 0x881   :  { %1764 = vxpose.xlu0.b32.start.end [1/1] (short) (narrow) %v1273_v61, 64 }
 0x884   :  { %v4101_v35 = vpop.permute.xlu0 %4100 }
 0x885   :  { %v4103_v36 = vunpack.i.h.bf16 %v4101_v35  ;;  %v4102_v37 = vunpack.i.l.bf16 %v4101_v35 }
 0x887   :  { %v4026_v38 = vpack.c.bf16 %v4103_v36, %v4102_v37 }
 0x897   :  { %v1343_v12 = vpop.f32.mrb[14].mxu1 }
 0x898   :  { %v3718_v13 = vpop.f32.mrb[15].mxu1 }
 0x8a7   :  { %v1416_v17 = vpop.f32.mrb[16].mxu1 }
 0x8a8   :  { %v3737_v43 = vpop.f32.mrb[17].mxu1  ;;  %3738 = vmatprep.subr.mxu1 %v1416_v17 }
 0x8a9   :  { %3739 = vmatpush3.msra.mxu1 %v1416_v17 }
 0x8aa   :  { %3741 = vmatmul.mubr.msk.f32.vlgmr.msra.gmra.mrb[18].mxu1 %vm376_vm2, %v1437_v63  ;;  %3752 = vmatprep.subr.mxu1 %v1343_v12 }
 0x8ab   :  { %3743 = vmatprep.mubr.msk.f32.mxu1 %vm376_vm2, %v1438_v9  ;;  %3753 = vmatpush3.msra.mxu1 %v1343_v12 }
 0x8ac   :  { %4013 = vmatprep.subr.bf16.mxu1 %v4164_v3 }
 0x8ae   :  { %3744 = vmatmul.mubr.msk.f32.gmra.mrb[20].mxu1 %vm376_vm2, %v1439_v14 }
 0x8af   :  { %3746 = vmatprep.mubr.msk.f32.mxu1 %vm376_vm2, %v1440_v16 }
 0x8b2   :  { %3747 = vmatmul.mubr.msk.f32.gmra.mrb[22].mxu1 %vm376_vm2, %v1441_v21 }
 0x8b3   :  { %3749 = vmatprep.mubr.msk.f32.mxu1 %vm376_vm2, %v1442_v4 }
 0x8b6   :  { %3750 = vmatmul.mubr.msk.f32.gmra.mrb[24].mxu1 %vm376_vm2, %v1443_v15 }
 0x8b7   :  { %3754 = vmatprep.mubr.msk.f32.mxu1 %vm376_vm2, %v1597_v2 }
 0x8ba   :  { %3755 = vmatmul.mubr.msk.f32.vlgmr.msra.gmra.mrb[18].mxu1 %vm376_vm2, %v1598_v5 }
 0x8bb   :  { %4016 = vmatpush3.bf16.xpose.msk.msra.mxu1 %vm4505_vm4, %v4014_v22  ;;  %3757 = vmatprep.mubr.msk.f32.mxu1 %vm376_vm2, %v1599_v0 }
 0x8bc   :  { %4017 = vmatprep.subr.bf16.mxu1 %v4164_v3 }
 0x8be   :  { %3758 = vmatmul.mubr.msk.f32.gmra.mrb[20].mxu1 %vm376_vm2, %v1600_v48  ;;  %v4713_v48 = vld [vmem:[%s4959_s8] ss:$0 sm:$0xff]  ;;  %s4170_s8 = smov 120  }
 0x8bf   :  { %3760 = vmatprep.mubr.msk.f32.mxu1 %vm376_vm2, %v1601_v11 }
 0x8c2   :  { %3761 = vmatmul.mubr.msk.f32.gmra.mrb[22].mxu1 %vm376_vm2, %v1602_v49 }
 0x8c3   :  { %4020 = vmatpush3.bf16.xpose.msk.msra.mxu1 %vm4505_vm4, %v4018_v30  ;;  %3763 = vmatprep.mubr.msk.f32.mxu1 %vm376_vm2, %v1603_v52 }
 0x8c4   :  { %4021 = vmatprep.subr.bf16.mxu1 %v4164_v3 }
 0x8c6   :  { %3764 = vmatmul.mubr.msk.f32.gmra.mrb[24].mxu1 %vm376_vm2, %v1604_v54 }
 0x8c7   :  { %3810 = vmatprep.mubr.msk.f32.mxu1 %vm4165_vm0, %v4166_v6 }
 0x8cb   :  { %4024 = vmatpush3.bf16.xpose.msk.msra.mxu1 %vm4505_vm4, %v4022_v34 }
 0x8cc   :  { %4025 = vmatprep.subr.bf16.mxu1 %v4164_v3 }
 0x8d3   :  { %4028 = vmatpush3.bf16.xpose.msk.msra.mxu1 %vm4505_vm4, %v4026_v38 }
 0x8d4   :  { %3885 = vmatprep.subr.mxu1 %v4169_v62 }
 0x8da   :  { %3811 = vmatmul.mubr.msk.f32.vlgmr.msra.gmra.mrb[26].mxu1 %vm105_vm1, %v4545_v53 }
 0x8db   :  { %3813 = vmatprep.mubr.msk.f32.mxu1 %vm4165_vm0, %v4166_v6  ;;  %3886 = vmatpush3.msra.mxu1 %v4169_v62 }
 0x8de   :  { %3814 = vmatmul.mubr.msk.f32.gmra.mrb[28].mxu1 %vm105_vm1, %v4554_v19  ;;  %v4701_v19 = vld [vmem:[%s4957_s6] sm:$0xff] }
 0x8df   :  { %3816 = vmatprep.mubr.msk.f32.mxu1 %vm4165_vm0, %v4166_v6  ;;  %3780 = vmatprep.subr.mxu0 %v4701_v19 }
 0x8e0   :  { %3899 = vmatprep.subr.mxu1 %v4701_v19 }
 0x8e2   :  { %3817 = vmatmul.mubr.msk.f32.gmra.mrb[30].mxu1 %vm105_vm1, %v4563_v20 }
 0x901   :  { %v1780_v40 = vpop.trf.xlu0 }
 0x902   :  { %3768 = vmatprep.mubr.msk.f32.mxu0 %vm376_vm2, %v1780_v40 }
 0x905   :  { %v1781_v1 = vpop.trf.xlu0 }
 0x906   :  { %3769 = vmatmul.mubr.msk.f32.vlgmr.msra.gmra.mrb[18].mxu0 %vm376_vm2, %v1781_v1 }
 0x907   :  { %3781 = vmatpush3.msra.mxu0 %v4701_v19 }
 0x908   :  { %4029 = vmatprep.subr.bf16.mxu0 %v4164_v3 }
 0x909   :  { %v1782_v53 = vpop.trf.xlu0 }
 0x90a   :  { %3771 = vmatprep.mubr.msk.f32.mxu0 %vm376_vm2, %v1782_v53 }
 0x90d   :  { %v1783_v7 = vpop.trf.xlu0 }
 0x90e   :  { %3772 = vmatmul.mubr.msk.f32.gmra.mrb[20].mxu0 %vm376_vm2, %v1783_v7 }
 0x911   :  { %v1784_v2 = vpop.trf.xlu0 }
 0x912   :  { %3774 = vmatprep.mubr.msk.f32.mxu0 %vm376_vm2, %v1784_v2 }
 0x915   :  { %v1785_v20 = vpop.trf.xlu0 }
 0x916   :  { %3775 = vmatmul.mubr.msk.f32.gmra.mrb[22].mxu0 %vm376_vm2, %v1785_v20 }
 0x919   :  { %v1786_v5 = vpop.trf.xlu0 }
 0x91a   :  { %3777 = vmatprep.mubr.msk.f32.mxu0 %vm376_vm2, %v1786_v5 }
 0x91d   :  { %v1787_v0 = vpop.trf.xlu0 }
 0x91e   :  { %3778 = vmatmul.mubr.msk.f32.gmra.mrb[24].mxu0 %vm376_vm2, %v1787_v0 }
 0x98d   :  { %v3756_v11 = vpop.f32.mrb[18].mxu1 }
 0x98e   :  { %v1749_v49 = vadd.f32 %v3756_v11, %v4713_v48  ;;  %v1703_v52 = vpop.f32.mrb[19].mxu1 }
 0x98f   :  { %v1748_v54 = vadd.f32 %v4713_v48, %v1703_v52 }
 0x990   :  { %v1757_v60 = vmax.f32 %v1749_v49, 0.0 }
 0x991   :  { %v1756_v55 = vmax.f32 %v1748_v54, 0.0  ;;  %v3759_v57 = vpop.f32.mrb[20].mxu1 }
 0x992   :  { %v1751_v61 = vadd.f32 %v3759_v57, %v4713_v48  ;;  %v1713_v62 = vpop.f32.mrb[21].mxu1 }
 0x993   :  { %v1750_v63 = vadd.f32 %v4713_v48, %v1713_v62  ;;  %3782 = vmatprep.mubr.msk.f32.mxu0 %vm376_vm2, %v1756_v55 }
 0x994   :  { %3783 = vmatmul.mubr.msk.f32.vlgmr.msra.gmra.mrb[26].mxu0 %vm376_vm2, %v1757_v60  ;;  %v1759_v13 = vmax.f32 %v1751_v61, 0.0 }
 0x995   :  { %v1758_v9 = vmax.f32 %v1750_v63, 0.0  ;;  %v3762_v12 = vpop.f32.mrb[22].mxu1  ;;  %4031 = vmatpush3.bf16.msra.mxu0 %v4470_v39 }
 0x996   :  { %v1753_v14 = vadd.f32 %v3762_v12, %v4713_v48  ;;  %v1723_v16 = vpop.f32.mrb[23].mxu1  ;;  %4032 = vmatprep.subr.bf16.mxu0 %v4164_v3 }
 0x997   :  { %v1752_v17 = vadd.f32 %v4713_v48, %v1723_v16  ;;  %3785 = vmatprep.mubr.msk.f32.mxu0 %vm376_vm2, %v1758_v9 }
 0x998   :  { %3786 = vmatmul.mubr.msk.f32.gmra.mrb[28].mxu0 %vm376_vm2, %v1759_v13  ;;  %v1761_v4 = vmax.f32 %v1753_v14, 0.0 }
 0x999   :  { %v1760_v43 = vmax.f32 %v1752_v17, 0.0  ;;  %v3765_v21 = vpop.f32.mrb[24].mxu1  ;;  %4034 = vmatpush3.bf16.msra.mxu0 %v4495_v47 }
 0x99a   :  { %v1755_v23 = vadd.f32 %v3765_v21, %v4713_v48  ;;  %v1733_v39 = vpop.f32.mrb[25].mxu1  ;;  %4035 = vmatprep.subr.bf16.mxu0 %v4164_v3 }
 0x99b   :  { %v1754_v25 = vadd.f32 %v4713_v48, %v1733_v39  ;;  %3788 = vmatprep.mubr.msk.f32.mxu0 %vm376_vm2, %v1760_v43 }
 0x99c   :  { %3789 = vmatmul.mubr.msk.f32.gmra.mrb[30].mxu0 %vm376_vm2, %v1761_v4  ;;  %v1763_v22 = vmax.f32 %v1755_v23, 0.0 }
 0x99d   :  { %v1762_v15 = vmax.f32 %v1754_v25, 0.0  ;;  %4037 = vmatpush3.bf16.msra.mxu0 %v4573_v56 }
 0x99e   :  { %4038 = vmatprep.subr.bf16.mxu0 %v4164_v3 }
 0x99f   :  { %3791 = vmatprep.mubr.msk.f32.mxu0 %vm376_vm2, %v1762_v15 }
 0x9a0   :  { %3792 = vmatmul.mubr.msk.f32.gmra.mrb[32].mxu0 %vm376_vm2, %v1763_v22 }
 0x9a1   :  { %4040 = vmatpush3.bf16.msra.mxu0 %v4583_v59  ;;  %3835 = vmatprep.mubr.msk.f32.mxu0 %vm4165_vm0, %v4166_v6 }
 0x9a2   :  { %4041 = vmatprep.subr.bf16.mxu0 %v4164_v3 }
 0x9ad   :  { %v2292_v47 = vpop.f32.mrb[26].mxu1 }
 0x9ae   :  { %v2293_v27 = vadd.f32 %v2292_v47, %v4589_v8  ;;  %v3812_v28 = vpop.f32.mrb[27].mxu1 }
 0x9b0   :  { %v2306_v30 = vmax.f32 %v2293_v27, 0.0 }
 0x9b1   :  { %v2297_v56 = vpop.f32.mrb[28].mxu1 }
 0x9b2   :  { %v2298_v31 = vadd.f32 %v2297_v56, %v4599_v18  ;;  %v3815_v33 = vpop.f32.mrb[29].mxu1  ;;  %2616 = vxpose.xlu0.b32.start.end [1/1] (short) (narrow) %v2306_v30, 64 }
 0x9b4   :  { %v2307_v34 = vmax.f32 %v2298_v31, 0.0 }
 0x9b5   :  { %v2302_v35 = vpop.f32.mrb[30].mxu1 }
 0x9b6   :  { %2455 = vxpose.xlu1.b32.start.end [1/1] (short) (narrow) %v2307_v34, 64  ;;  %3836 = vmatmul.mubr.msk.f32.vlgmr.msra.gmra.mrb[34].mxu0 %vm105_vm1, %v2307_v34  ;;  %v3818_v59 = vpop.f32.mrb[31].mxu1  ;;  %v2303_v8 = vadd.f32 %v2302_v35, %v4649_v58 }
 0x9b7   :  { %4043 = vmatpush3.bf16.msra.mxu0 %v4602_v24  ;;  %3854 = vmatprep.mubr.msk.f32.mxu0 %vm4165_vm0, %v4166_v6 }
 0x9b8   :  { %4044 = vmatprep.subr.bf16.mxu0 %v4164_v3  ;;  %v2308_v18 = vmax.f32 %v2303_v8, 0.0 }
 0x9bb   :  { %4046 = vmatpush3.bf16.msra.mxu0 %v4612_v26 }
 0x9bc   :  { %4047 = vmatprep.subr.bf16.mxu0 %v4164_v3 }
 0x9bf   :  { %4049 = vmatpush3.bf16.msra.mxu0 %v4624_v29 }
 0x9c0   :  { %4050 = vmatprep.subr.bf16.mxu0 %v4164_v3 }
 0x9c3   :  { %4052 = vmatpush3.bf16.msra.mxu0 %v4634_v32 }
 0x9c6   :  { %3855 = vmatmul.mubr.msk.f32.vlgmr.msra.gmra.mrb[36].mxu0 %vm105_vm1, %v2306_v30 }
 0x9d3   :  { %2793 = vxpose.xlu1.b32.start.end [1/1] (short) (narrow) %v2308_v18, 64 }
 0x9d9   :  { %v3770_v24 = vpop.f32.mrb[18].mxu0 }
 0x9da   :  { %v1886_v6 = vpop.f32.mrb[19].mxu0 }
 0x9e1   :  { %v3773_v36 = vpop.f32.mrb[20].mxu0 }
 0x9e2   :  { %v1896_v37 = vpop.f32.mrb[21].mxu0 }
 0x9e9   :  { %v3776_v38 = vpop.f32.mrb[22].mxu0 }
 0x9ea   :  { %v1906_v26 = vpop.f32.mrb[23].mxu0 }
 0x9f1   :  { %v3779_v40 = vpop.f32.mrb[24].mxu0 }
 0x9f2   :  { %v1916_v1 = vpop.f32.mrb[25].mxu0 }
 0x9f7   :  { %1925 = vrot.lane.b32.xlu0 %v4713_v48, %s4170_s8 }
 0x9fb   :  { %2092 = vrot.lane.b32.xlu0 %v4713_v48, %s4171_s25 }
 0x9ff   :  { %2111 = vrot.lane.b32.xlu0 %v4713_v48, %s4172_s26 }
 0xa0d   :  { %2073 = vrot.lane.b32.xlu1 %v4713_v48, %s4173_s27 }
 0xa32   :  { %v4760_v29 = vpop.trf.xlu0 }
 0xa36   :  { %v2471_v3 = vpop.trf.xlu1  ;;  %v4766_v53 = vpop.trf.xlu0 }
 0xa37   :  { %3859 = vmatprep.mubr.msk.f32.mxu0 %vm376_vm2, %v2471_v3 }
 0xa3a   :  { %v4762_v32 = vpop.trf.xlu1  ;;  %v4770_v2 = vpop.trf.xlu0 }
 0xa3e   :  { %v4764_v58 = vpop.trf.xlu1  ;;  %v4776_v0 = vpop.trf.xlu0 }
 0xa42   :  { %v4768_v7 = vpop.trf.xlu1  ;;  %v4780_v49 = vpop.trf.xlu0 }
 0xa46   :  { %v4772_v20 = vpop.trf.xlu1  ;;  %v4784_v55 = vpop.trf.xlu0 }
 0xa4a   :  { %v4774_v5 = vpop.trf.xlu1  ;;  %v4789_v60 = vpop.trf.xlu0 }
 0xa4e   :  { %v4778_v11 = vpop.trf.xlu1  ;;  %v4792_v63 = vpop.trf.xlu0 }
 0xa52   :  { %v4782_v52 = vpop.trf.xlu1 }
 0xa56   :  { %v2809_v54 = vpop.trf.xlu1 }
 0xa57   :  { %3887 = vmatprep.mubr.msk.f32.mxu1 %vm376_vm2, %v2809_v54 }
 0xa5a   :  { %v2810_v57 = vpop.trf.xlu1 }
 0xa5b   :  { %3888 = vmatmul.mubr.msk.f32.vlgmr.msra.gmra.mrb[32].mxu1 %vm376_vm2, %v2810_v57 }
 0xa5c   :  { %3900 = vmatpush3.msra.mxu1 %v4701_v19 }
 0xa5e   :  { %v2811_v61 = vpop.trf.xlu1 }
 0xa5f   :  { %3890 = vmatprep.mubr.msk.f32.mxu1 %vm376_vm2, %v2811_v61 }
 0xa62   :  { %v2812_v62 = vpop.trf.xlu1 }
 0xa63   :  { %3891 = vmatmul.mubr.msk.f32.gmra.mrb[34].mxu1 %vm376_vm2, %v2812_v62 }
 0xa66   :  { %v2813_v9 = vpop.trf.xlu1 }
 0xa67   :  { %v3784_v12 = vpop.f32.mrb[26].mxu0  ;;  %3893 = vmatprep.mubr.msk.f32.mxu1 %vm376_vm2, %v2813_v9 }
 0xa68   :  { %v2026_v13 = vpop.f32.mrb[27].mxu0 }
 0xa69   :  { %v4796_v14 = vpop.permute.xlu0 %1925 }
 0xa6a   :  { %v1928_v16 = vmul.f32 %v4796_v14, %v1886_v6  ;;  %v1931_v19 = vmul.f32 %v3773_v36, %v4796_v14  ;;  %v2814_v17 = vpop.trf.xlu1  ;;  %v1930_v21 = vmul.f32 %v4796_v14, %v1896_v37  ;;  %v1929_v4 = vmul.f32 %v3770_v24, %v4796_v14 }
 0xa6b   :  { %v3787_v43 = vpop.f32.mrb[28].mxu0  ;;  %3894 = vmatmul.mubr.msk.f32.gmra.mrb[36].mxu1 %vm376_vm2, %v2814_v17  ;;  %v1933_v15 = vmul.f32 %v3776_v38, %v4796_v14  ;;  %v1932_v30 = vmul.f32 %v4796_v14, %v1906_v26  ;;  %v1935_v33 = vmul.f32 %v3779_v40, %v4796_v14  ;;  %v1934_v35 = vmul.f32 %v4796_v14, %v1916_v1 }
 0xa6c   :  { %v2065_v23 = vadd.f32 %v2026_v13, %v1928_v16  ;;  %v2068_v39 = vadd.f32 %v3787_v43, %v1931_v19  ;;  %v2036_v25 = vpop.f32.mrb[29].mxu0  ;;  %v2066_v47 = vadd.f32 %v3784_v12, %v1929_v4 }
 0xa6d   :  { %v2067_v22 = vadd.f32 %v2036_v25, %v1930_v21  ;;  %v4809_v36 = vpop.permute.xlu0 %2092 }
 0xa6e   :  { %v2815_v27 = vpop.trf.xlu1 }
 0xa6f   :  { %v3790_v28 = vpop.f32.mrb[30].mxu0  ;;  %3896 = vmatprep.mubr.msk.f32.mxu1 %vm376_vm2, %v2815_v27 }
 0xa70   :  { %v2070_v56 = vadd.f32 %v3790_v28, %v1933_v15  ;;  %v2046_v31 = vpop.f32.mrb[31].mxu0 }
 0xa71   :  { %v2069_v34 = vadd.f32 %v2046_v31, %v1932_v30  ;;  %v4820_v13 = vpop.permute.xlu0 %2111 }
 0xa72   :  { %v2816_v59 = vpop.trf.xlu1 }
 0xa73   :  { %v3793_v8 = vpop.f32.mrb[32].mxu0  ;;  %3897 = vmatmul.mubr.msk.f32.gmra.mrb[38].mxu1 %vm376_vm2, %v2816_v59 }
 0xa74   :  { %v2072_v18 = vadd.f32 %v3793_v8, %v1935_v33  ;;  %v2056_v24 = vpop.f32.mrb[33].mxu0 }
 0xa75   :  { %v2071_v6 = vadd.f32 %v2056_v24, %v1934_v35 }
 0xa7f   :  { %v4811_v37 = vpop.permute.xlu1 %2073 }
 0xa80   :  { %v2077_v38 = vadd.f32 %v4811_v37, %v2066_v47  ;;  %v2078_v26 = vadd.f32 %v4811_v37, %v2067_v22  ;;  %v2076_v40 = vadd.f32 %v4811_v37, %v2065_v23  ;;  %v2080_v3 = vadd.f32 %v4811_v37, %v2069_v34 }
 0xa81   :  { %v2079_v1 = vadd.f32 %v4811_v37, %v2068_v39  ;;  %v2082_v54 = vadd.f32 %v4811_v37, %v2071_v6  ;;  %v2081_v57 = vadd.f32 %v4811_v37, %v2070_v56  ;;  %v2083_v43 = vadd.f32 %v4811_v37, %v2072_v18 }
 0xa82   :  { %v2085_v61 = vmax.f32 %v2077_v38, 0.0  ;;  %v2086_v62 = vmax.f32 %v2078_v26, 0.0  ;;  %v2084_v9 = vmax.f32 %v2076_v40, 0.0  ;;  %v2088_v12 = vmax.f32 %v2080_v3, 0.0 }
 0xa83   :  { %v2087_v16 = vmax.f32 %v2079_v1, 0.0  ;;  %v2090_v19 = vmax.f32 %v2082_v54, 0.0  ;;  %v2089_v17 = vmax.f32 %v2081_v57, 0.0  ;;  %v2091_v33 = vmax.f32 %v2083_v43, 0.0 }
 0xa84   :  { %v2096_v21 = vmul.f32 %v4809_v36, %v2085_v61  ;;  %v2097_v4 = vmul.f32 %v4809_v36, %v2086_v62  ;;  %v2095_v23 = vmul.f32 %v4809_v36, %v2084_v9  ;;  %v2099_v39 = vmul.f32 %v4809_v36, %v2088_v12 }
 0xa85   :  { %v2098_v25 = vmul.f32 %v4809_v36, %v2087_v16  ;;  %v2101_v15 = vmul.f32 %v4809_v36, %v2090_v19  ;;  %v2100_v31 = vmul.f32 %v4809_v36, %v2089_v17  ;;  %v2102_v40 = vmul.f32 %v4809_v36, %v2091_v33 }
 0xa86   :  { %v2115_v22 = vadd.f32 %v4820_v13, %v2096_v21  ;;  %v2116_v47 = vadd.f32 %v4820_v13, %v2097_v4  ;;  %v2114_v27 = vadd.f32 %v4820_v13, %v2095_v23  ;;  %v2118_v28 = vadd.f32 %v4820_v13, %v2099_v39 }
 0xa87   :  { %v2117_v30 = vadd.f32 %v4820_v13, %v2098_v25  ;;  %v2120_v56 = vadd.f32 %v4820_v13, %v2101_v15  ;;  %v2119_v26 = vadd.f32 %v4820_v13, %v2100_v31  ;;  %v2121_v1 = vadd.f32 %v4820_v13, %v2102_v40 }
 0xa88   :  { %v2123_v34 = vmul.f32 0.5, %v2115_v22  ;;  %v2124_v35 = vmul.f32 0.5, %v2116_v47  ;;  %v2122_v59 = vmul.f32 0.5, %v2114_v27  ;;  %v2126_v18 = vmul.f32 0.5, %v2118_v28 }
 0xa89   :  { %v2378_v8 = vpop.f32.mrb[34].mxu0  ;;  %v2125_v6 = vmul.f32 0.5, %v2117_v30  ;;  %v2128_v38 = vmul.f32 0.5, %v2120_v56  ;;  %v2127_v3 = vmul.f32 0.5, %v2119_v26  ;;  %v2129_v54 = vmul.f32 0.5, %v2121_v1 }
 0xa8a   :  { %v3837_v24 = vpop.f32.mrb[35].mxu0  ;;  %4108 = vtanh.f32 %v2123_v34 }
 0xa8b   :  { %4110 = vtanh.f32 %v2124_v35 }
 0xa8c   :  { %4112 = vtanh.f32 %v2122_v59 }
 0xa8d   :  { %4114 = vtanh.f32 %v2126_v18 }
 0xa8e   :  { %4116 = vtanh.f32 %v2125_v6 }
 0xa8f   :  { %4118 = vtanh.f32 %v2128_v38 }
 0xa90   :  { %4120 = vtanh.f32 %v2127_v3 }
 0xa91   :  { %4122 = vtanh.f32 %v2129_v54 }
 0xa94   :  { %v4109_v57 = vpop.eup %4108 }
 0xa95   :  { %v4111_v61 = vpop.eup %4110  ;;  %v2139_v62 = vmul.f32 0.5, %v4109_v57 }
 0xa96   :  { %v4113_v9 = vpop.eup %4112  ;;  %v2140_v12 = vmul.f32 0.5, %v4111_v61 }
 0xa97   :  { %v4115_v16 = vpop.eup %4114  ;;  %v2147_v19 = vadd.f32 0.5, %v2139_v62  ;;  %v2138_v21 = vmul.f32 0.5, %v4113_v9 }
 0xa98   :  { %v4117_v17 = vpop.eup %4116  ;;  %v2148_v43 = vadd.f32 0.5, %v2140_v12  ;;  %v2142_v4 = vmul.f32 0.5, %v4115_v16 }
 0xa99   :  { %v4119_v23 = vpop.eup %4118  ;;  %v2451_v39 = vpop.f32.mrb[36].mxu0  ;;  %2161 = vperm.xlu0 %4082, %v2147_v19   ;;  %v2146_v15 = vadd.f32 0.5, %v2138_v21  ;;  %v2141_v47 = vmul.f32 0.5, %v4117_v17 }
 0xa9a   :  { %2166 = vperm.xlu1 %4083, %v2148_v43   ;;  %v3856_v25 = vpop.f32.mrb[37].mxu0  ;;  %3857 = vmatprep.subr.mxu0 %v2451_v39  ;;  %v2150_v22 = vadd.f32 0.5, %v2142_v4  ;;  %v2144_v27 = vmul.f32 0.5, %v4119_v23  ;;  %v4121_v28 = vpop.eup %4120 }
 0xa9b   :  { %3858 = vmatpush3.msra.mxu0 %v2451_v39  ;;  %v2149_v30 = vadd.f32 0.5, %v2141_v47  ;;  %v2143_v31 = vmul.f32 0.5, %v4121_v28  ;;  %v4123_v33 = vpop.eup %4122 }
 0xa9c   :  { %3860 = vmatmul.mubr.msk.f32.vlgmr.msra.gmra.mrb[38].mxu0 %vm376_vm2, %v4762_v32  ;;  %3871 = vmatprep.subr.mxu0 %v2378_v8  ;;  %v2152_v56 = vadd.f32 0.5, %v2144_v27 }
 0xa9d   :  { %3862 = vmatprep.mubr.msk.f32.mxu0 %vm376_vm2, %v4764_v58  ;;  %3872 = vmatpush3.msra.mxu0 %v2378_v8  ;;  %v2151_v32 = vadd.f32 0.5, %v2143_v31  ;;  %v2145_v58 = vmul.f32 0.5, %v4123_v33 }
 0xa9e   :  { %2156 = vperm.xlu0 %4082, %v2146_v15   ;;  %2176 = vperm.xlu1 %4083, %v2150_v22  }
 0xaa0   :  { %3863 = vmatmul.mubr.msk.f32.gmra.mrb[40].mxu0 %vm376_vm2, %v4768_v7  ;;  %v2153_v7 = vadd.f32 0.5, %v2145_v58 }
 0xaa1   :  { %3865 = vmatprep.mubr.msk.f32.mxu0 %vm376_vm2, %v4772_v20 }
 0xaa2   :  { %2171 = vperm.xlu0 %4082, %v2149_v30   ;;  %2186 = vperm.xlu1 %4083, %v2152_v56  }
 0xaa4   :  { %3866 = vmatmul.mubr.msk.f32.gmra.mrb[42].mxu0 %vm376_vm2, %v4774_v5 }
 0xaa5   :  { %3868 = vmatprep.mubr.msk.f32.mxu0 %vm376_vm2, %v4778_v11 }
 0xaa6   :  { %2181 = vperm.xlu0 %4082, %v2151_v32  }
 0xaa8   :  { %3869 = vmatmul.mubr.msk.f32.gmra.mrb[44].mxu0 %vm376_vm2, %v4782_v52 }
 0xaa9   :  { %3873 = vmatprep.mubr.msk.f32.mxu0 %vm376_vm2, %v4760_v29 }
 0xaaa   :  { %2191 = vperm.xlu0 %4082, %v2153_v7  }
 0xaac   :  { %3874 = vmatmul.mubr.msk.f32.vlgmr.msra.gmra.mrb[38].mxu0 %vm376_vm2, %v4766_v53 }
 0xaad   :  { %3876 = vmatprep.mubr.msk.f32.mxu0 %vm376_vm2, %v4770_v2 }
 0xab0   :  { %3877 = vmatmul.mubr.msk.f32.gmra.mrb[40].mxu0 %vm376_vm2, %v4776_v0 }
 0xab1   :  { %3879 = vmatprep.mubr.msk.f32.mxu0 %vm376_vm2, %v4780_v49 }
 0xab4   :  { %3880 = vmatmul.mubr.msk.f32.gmra.mrb[42].mxu0 %vm376_vm2, %v4784_v55 }
 0xab5   :  { %3882 = vmatprep.mubr.msk.f32.mxu0 %vm376_vm2, %v4789_v60 }
 0xab8   :  { %3883 = vmatmul.mubr.msk.f32.gmra.mrb[44].mxu0 %vm376_vm2, %v4792_v63 }
 0xb2e   :  { %v3889_v29 = vpop.f32.mrb[32].mxu1 }
 0xb2f   :  { %v2915_v53 = vpop.f32.mrb[33].mxu1  ;;  %v2955_v17 = vmul.f32 %v3889_v29, %v4796_v14 }
 0xb30   :  { %v2954_v43 = vmul.f32 %v2915_v53, %v4796_v14 }
 0xb36   :  { %v3892_v20 = vpop.f32.mrb[34].mxu1 }
 0xb37   :  { %v2925_v5 = vpop.f32.mrb[35].mxu1 }
 0xb38   :  { %v2956_v15 = vmul.f32 %v2925_v5, %v4796_v14 }
 0xb3e   :  { %v3895_v2 = vpop.f32.mrb[36].mxu1 }
 0xb3f   :  { %v2935_v11 = vpop.f32.mrb[37].mxu1  ;;  %v2959_v33 = vmul.f32 %v3895_v2, %v4796_v14 }
 0xb40   :  { %v2958_v7 = vmul.f32 %v2935_v11, %v4796_v14 }
 0xb46   :  { %v4869_v52 = vpop.f32.mrb[38].mxu1 }
 0xb47   :  { %v4871_v0 = vpop.f32.mrb[39].mxu1 }
 0xb7f   :  { %v3875_v49 = vpop.f32.mrb[38].mxu0 }
 0xb80   :  { %v2778_v34 = vadd.f32 %v3875_v49, %v4713_v48  ;;  %v2738_v55 = vpop.f32.mrb[39].mxu0 }
 0xb81   :  { %v2777_v35 = vadd.f32 %v4713_v48, %v2738_v55 }
 0xb82   :  { %v2786_v8 = vmax.f32 %v2778_v34, 0.0 }
 0xb83   :  { %v2785_v60 = vmax.f32 %v2777_v35, 0.0  ;;  %v3878_v59 = vpop.f32.mrb[40].mxu0 }
 0xb84   :  { %v2780_v63 = vadd.f32 %v3878_v59, %v4713_v48  ;;  %v2748_v18 = vpop.f32.mrb[41].mxu0  ;;  %v2961_v59 = vmul.f32 %v4869_v52, %v4796_v14 }
 0xb85   :  { %v2779_v24 = vadd.f32 %v4713_v48, %v2748_v18  ;;  %3901 = vmatprep.mubr.msk.f32.mxu1 %vm376_vm2, %v2785_v60  ;;  %v2960_v18 = vmul.f32 %v4871_v0, %v4796_v14 }
 0xb86   :  { %3902 = vmatmul.mubr.msk.f32.vlgmr.msra.gmra.mrb[40].mxu1 %vm376_vm2, %v2786_v8  ;;  %v2788_v26 = vmax.f32 %v2780_v63, 0.0 }
 0xb87   :  { %v2787_v6 = vmax.f32 %v2779_v24, 0.0  ;;  %v3881_v38 = vpop.f32.mrb[42].mxu0 }
 0xb88   :  { %v2782_v40 = vadd.f32 %v3881_v38, %v4713_v48  ;;  %v2758_v3 = vpop.f32.mrb[43].mxu0 }
 0xb89   :  { %v2781_v1 = vadd.f32 %v4713_v48, %v2758_v3  ;;  %3904 = vmatprep.mubr.msk.f32.mxu1 %vm376_vm2, %v2787_v6 }
 0xb8a   :  { %3905 = vmatmul.mubr.msk.f32.gmra.mrb[42].mxu1 %vm376_vm2, %v2788_v26  ;;  %v2790_v61 = vmax.f32 %v2782_v40, 0.0 }
 0xb8b   :  { %v2789_v54 = vmax.f32 %v2781_v1, 0.0  ;;  %v3884_v57 = vpop.f32.mrb[44].mxu0 }
 0xb8c   :  { %v2784_v62 = vadd.f32 %v3884_v57, %v4713_v48  ;;  %v2768_v9 = vpop.f32.mrb[45].mxu0 }
 0xb8d   :  { %v2783_v12 = vadd.f32 %v4713_v48, %v2768_v9  ;;  %3907 = vmatprep.mubr.msk.f32.mxu1 %vm376_vm2, %v2789_v54  ;;  %v2957_v48 = vmul.f32 %v3892_v20, %v4796_v14 }
 0xb8e   :  { %3908 = vmatmul.mubr.msk.f32.gmra.mrb[44].mxu1 %vm376_vm2, %v2790_v61  ;;  %v2792_v19 = vmax.f32 %v2784_v62, 0.0 }
 0xb8f   :  { %v2791_v16 = vmax.f32 %v2783_v12, 0.0 }
 0xb91   :  { %3910 = vmatprep.mubr.msk.f32.mxu1 %vm376_vm2, %v2791_v16 }
 0xb92   :  { %3911 = vmatmul.mubr.msk.f32.gmra.mrb[46].mxu1 %vm376_vm2, %v2792_v19 }
 0xc59   :  { %v3903_v21 = vpop.f32.mrb[40].mxu1 }
 0xc5a   :  { %v3092_v4 = vadd.f32 %v3903_v21, %v2955_v17  ;;  %v3052_v23 = vpop.f32.mrb[41].mxu1 }
 0xc5b   :  { %v3091_v39 = vadd.f32 %v3052_v23, %v2954_v43 }
 0xc5c   :  { %v3100_v25 = vadd.f32 %v3092_v4, %v4811_v37 }
 0xc5d   :  { %v3099_v22 = vadd.f32 %v3091_v39, %v4811_v37  ;;  %v3906_v47 = vpop.f32.mrb[42].mxu1 }
 0xc5e   :  { %v3108_v27 = vmax.f32 %v3100_v25, 0.0  ;;  %v3094_v28 = vadd.f32 %v3906_v47, %v2957_v48  ;;  %v3062_v30 = vpop.f32.mrb[43].mxu1 }
 0xc5f   :  { %v3107_v56 = vmax.f32 %v3099_v22, 0.0  ;;  %v3093_v31 = vadd.f32 %v3062_v30, %v2956_v15 }
 0xc60   :  { %v3116_v32 = vmul.f32 %v3108_v27, %v4809_v36  ;;  %v3102_v58 = vadd.f32 %v3094_v28, %v4811_v37 }
 0xc61   :  { %v3115_v29 = vmul.f32 %v3107_v56, %v4809_v36  ;;  %v3101_v53 = vadd.f32 %v3093_v31, %v4811_v37  ;;  %v3909_v20 = vpop.f32.mrb[44].mxu1 }
 0xc62   :  { %v3132_v5 = vadd.f32 %v3116_v32, %v4820_v13  ;;  %v3110_v49 = vmax.f32 %v3102_v58, 0.0  ;;  %v3096_v34 = vadd.f32 %v3909_v20, %v2959_v33  ;;  %v3072_v55 = vpop.f32.mrb[45].mxu1 }
 0xc63   :  { %v3131_v35 = vadd.f32 %v3115_v29, %v4820_v13  ;;  %v3109_v60 = vmax.f32 %v3101_v53, 0.0  ;;  %v3095_v2 = vadd.f32 %v3072_v55, %v2958_v7 }
 0xc64   :  { %v3140_v8 = vmul.f32 0.5, %v3132_v5  ;;  %v3118_v11 = vmul.f32 %v3110_v49, %v4809_v36  ;;  %v3104_v63 = vadd.f32 %v3096_v34, %v4811_v37 }
 0xc65   :  { %v3139_v24 = vmul.f32 0.5, %v3131_v35  ;;  %v3117_v6 = vmul.f32 %v3109_v60, %v4809_v36  ;;  %v3103_v38 = vadd.f32 %v3095_v2, %v4811_v37  ;;  %v3912_v26 = vpop.f32.mrb[46].mxu1 }
 0xc66   :  { %v3134_v40 = vadd.f32 %v3118_v11, %v4820_v13  ;;  %v3112_v3 = vmax.f32 %v3104_v63, 0.0  ;;  %v3098_v1 = vadd.f32 %v3912_v26, %v2961_v59  ;;  %v3082_v54 = vpop.f32.mrb[47].mxu1  ;;  %4124 = vtanh.f32 %v3140_v8  ;;  %v2162_v11 = vpop.permute.xlu0 %2161 }
 0xc67   :  { %v3133_v52 = vadd.f32 %v3117_v6, %v4820_v13  ;;  %v3111_v57 = vmax.f32 %v3103_v38, 0.0  ;;  %v3097_v61 = vadd.f32 %v3082_v54, %v2960_v18  ;;  %4126 = vtanh.f32 %v3139_v24  ;;  %v2167_v24 = vpop.permute.xlu1 %2166 }
 0xc68   :  { %v3142_v62 = vmul.f32 0.5, %v3134_v40  ;;  %v3120_v14 = vmul.f32 %v3112_v3, %v4809_v36  ;;  %v3106_v0 = vadd.f32 %v3098_v1, %v4811_v37 }
 0xc69   :  { %v3141_v9 = vmul.f32 0.5, %v3133_v52  ;;  %v3119_v12 = vmul.f32 %v3111_v57, %v4809_v36  ;;  %v3105_v16 = vadd.f32 %v3097_v61, %v4811_v37 }
 0xc6a   :  { %v3136_v19 = vadd.f32 %v3120_v14, %v4820_v13  ;;  %v3114_v17 = vmax.f32 %v3106_v0, 0.0  ;;  %4128 = vtanh.f32 %v3142_v62  ;;  %v2157_v63 = vpop.permute.xlu0 %2156 }
 0xc6b   :  { %v3135_v43 = vadd.f32 %v3119_v12, %v4820_v13  ;;  %v3113_v21 = vmax.f32 %v3105_v16, 0.0  ;;  %4130 = vtanh.f32 %v3141_v9  ;;  %v2177_v38 = vpop.permute.xlu1 %2176 }
 0xc6c   :  { %v3144_v4 = vmul.f32 0.5, %v3136_v19  ;;  %v3122_v23 = vmul.f32 %v3114_v17, %v4809_v36 }
 0xc6d   :  { %v3143_v39 = vmul.f32 0.5, %v3135_v43  ;;  %v3121_v48 = vmul.f32 %v3113_v21, %v4809_v36 }
 0xc6e   :  { %v3138_v25 = vadd.f32 %v3122_v23, %v4820_v13  ;;  %4132 = vtanh.f32 %v3144_v4  ;;  %v2172_v18 = vpop.permute.xlu0 %2171 }
 0xc6f   :  { %v3137_v15 = vadd.f32 %v3121_v48, %v4820_v13  ;;  %4134 = vtanh.f32 %v3143_v39  ;;  %v2187_v40 = vpop.permute.xlu1 %2186 }
 0xc70   :  { %v4125_v37 = vpop.eup %4124  ;;  %v3146_v22 = vmul.f32 0.5, %v3138_v25 }
 0xc71   :  { %v4127_v47 = vpop.eup %4126  ;;  %v3145_v27 = vmul.f32 0.5, %v3137_v15  ;;  %v3156_v28 = vmul.f32 0.5, %v4125_v37 }
 0xc72   :  { %v3155_v30 = vmul.f32 0.5, %v4127_v47  ;;  %4136 = vtanh.f32 %v3146_v22  ;;  %v2182_v6 = vpop.permute.xlu0 %2181 }
 0xc73   :  { %v3164_v56 = vadd.f32 0.5, %v3156_v28  ;;  %4138 = vtanh.f32 %v3145_v27 }
 0xc74   :  { %v4129_v31 = vpop.eup %4128  ;;  %v3163_v33 = vadd.f32 0.5, %v3155_v30 }
 0xc75   :  { %v4131_v32 = vpop.eup %4130  ;;  %3178 = vperm.xlu0 %4082, %v3164_v56   ;;  %v3158_v36 = vmul.f32 0.5, %v4129_v31 }
 0xc76   :  { %3173 = vperm.xlu1 %4083, %v3163_v33   ;;  %v3157_v58 = vmul.f32 0.5, %v4131_v32  ;;  %v2192_v26 = vpop.permute.xlu0 %2191 }
 0xc77   :  { %v3166_v7 = vadd.f32 0.5, %v3158_v36 }
 0xc78   :  { %v4133_v29 = vpop.eup %4132  ;;  %v3165_v13 = vadd.f32 0.5, %v3157_v58 }
 0xc79   :  { %v4135_v53 = vpop.eup %4134  ;;  %3188 = vperm.xlu0 %4082, %v3166_v7   ;;  %v3160_v20 = vmul.f32 0.5, %v4133_v29 }
 0xc7a   :  { %3183 = vperm.xlu1 %4083, %v3165_v13   ;;  %v3159_v5 = vmul.f32 0.5, %v4135_v53 }
 0xc7b   :  { %v3168_v49 = vadd.f32 0.5, %v3160_v20 }
 0xc7c   :  { %v4137_v34 = vpop.eup %4136  ;;  %v3167_v55 = vadd.f32 0.5, %v3159_v5 }
 0xc7d   :  { %v4139_v35 = vpop.eup %4138  ;;  %3198 = vperm.xlu0 %4082, %v3168_v49   ;;  %v3162_v60 = vmul.f32 0.5, %v4137_v34 }
 0xc7e   :  { %3193 = vperm.xlu1 %4083, %v3167_v55   ;;  %v3161_v2 = vmul.f32 0.5, %v4139_v35 }
 0xc7f   :  { %v3170_v59 = vadd.f32 0.5, %v3162_v60 }
 0xc80   :  { %v3169_v8 = vadd.f32 0.5, %v3161_v2 }
 0xc81   :  { %3208 = vperm.xlu0 %4082, %v3170_v59  }
 0xc82   :  { %3203 = vperm.xlu1 %4083, %v3169_v8  }
 0xcf4   :  { %v3179_v3 = vpop.permute.xlu0 %3178 }
 0xcf5   :  { %v3212_v1 = vsel %vm105_vm1, %v2162_v11, %v3179_v3  ;;  %v3174_v54 = vpop.permute.xlu1 %3173 }
 0xcf6   :  { %v3220_v52 = vmul.f32 %v3212_v1, %v4488_v45  ;;  %v3211_v57 = vsel %vm105_vm1, %v2157_v63, %v3174_v54 }
 0xcf7   :  { %v3219_v61 = vmul.f32 %v3211_v57, %v4485_v44 }
 0xcf8   :  { %3228 = vst [vmem:[#allocation2 + $0x8] sm:$0xff] %v3220_v52  ;;  %v3189_v62 = vpop.permute.xlu0 %3188 }
 0xcf9   :  { %3227 = vst [vmem:[#allocation2] sm:$0xff] %v3219_v61  ;;  %v3214_v14 = vsel %vm105_vm1, %v2172_v18, %v3189_v62  ;;  %v3184_v0 = vpop.permute.xlu1 %3183 }
 0xcfa   :  { %v3222_v9 = vmul.f32 %v3214_v14, %v4482_v42  ;;  %v3213_v12 = vsel %vm105_vm1, %v2167_v24, %v3184_v0 }
 0xcfb   :  { %v3221_v16 = vmul.f32 %v3213_v12, %v4479_v41 }
 0xcfc   :  { %3230 = vst [vmem:[#allocation2 + $0x18] sm:$0xff] %v3222_v9  ;;  %v3199_v19 = vpop.permute.xlu0 %3198 }
 0xcfd   :  { %3229 = vst [vmem:[#allocation2 + $0x10] sm:$0xff] %v3221_v16  ;;  %v3216_v45 = vsel %vm105_vm1, %v2182_v6, %v3199_v19  ;;  %v3194_v17 = vpop.permute.xlu1 %3193 }
 0xcfe   :  { %v3224_v44 = vmul.f32 %v3216_v45, %v4510_v10  ;;  %v3215_v43 = vsel %vm105_vm1, %v2177_v38, %v3194_v17 }
 0xcff   :  { %v3223_v21 = vmul.f32 %v3215_v43, %v4492_v46 }
 0xd00   :  { %3232 = vst [vmem:[#allocation2 + $0x28] sm:$0xff] %v3224_v44  ;;  %v3209_v4 = vpop.permute.xlu0 %3208 }
 0xd01   :  { %3231 = vst [vmem:[#allocation2 + $0x20] sm:$0xff] %v3223_v21  ;;  %v3218_v42 = vsel %vm105_vm1, %v2192_v26, %v3209_v4  ;;  %v3204_v41 = vpop.permute.xlu1 %3203 }
 0xd02   :  { %v3226_v23 = vmul.f32 %v3218_v42, %v4536_v51  ;;  %v3217_v39 = vsel %vm105_vm1, %v2187_v40, %v3204_v41 }
 0xd03   :  { %v3225_v48 = vmul.f32 %v3217_v39, %v4533_v50 }
 0xd04   :  { %3234 = vst [vmem:[#allocation2 + $0x38] sm:$0xff] %v3226_v23 }
 0xd05   :  { %3233 = vst [vmem:[#allocation2 + $0x30] sm:$0xff] %v3225_v48 }
 0xd06   :  { %4151 = shalt.err (!%p4148_p4)
}
 0xd07   :  { %s4152_s10 = scalar_lea.hbm %s4960_s9, 1024 }
 0xd08   :  { %p4153_p5 = scmp.ne.s32.totalorder %s4960_s9, %s4152_s10  ;;  %p4156_p6 = scmp.lt.u32.totalorder %s4152_s10, %s4960_s9 }
 0xd0a   :  { %p4158_p7 = pnand %p4156_p6, %p4153_p5 }
 0xd0c   :  { %4161 = shalt.err (!%p4158_p7)
}
 0xd0d   :  { %s4175_s15 = smov 128   ;;  %s4176_s16 = smov 8  }
 0xd0e   :  { %3246 = dma.vmem_to_hbm [thread:$0]  %s3241_s4, 1024, %s4960_s9, [#allocation3], %s4175_s15, %s4175_s15, %s4176_s16  }
 0xd0f   :  { %4162 = dma.done.wait [#allocation3], 1024  }
 0xd10   :  { %4163 = vsyncadd [#allocation3], 4294966272 }
 0xd11   :  { %3250 = vsyncpa [#allocation3], 1 }

</bundles_post_ra>
